<compile_context>
chip_gen: v7x
topology: tpu7x:2x2x1
jax: 0.10.0
libtpu: 0.0.40
codegen_flags: <defaults>
</compile_context>

<pallas_src>
import functools

import jax
import jax.numpy as jnp
from jax.experimental import pallas as pl
from jax.experimental.pallas import tpu as pltpu


def _round_up(x, m):
    return (x + m - 1) // m * m


# --------------------------------- kernel -------------------------------------
def gated_gcn_kernel(
    x_ref, a_ref, msk_ref,
    wg1_ref, wgru1m_ref, wgru1h_ref, bgru1_ref,
    wg2_ref, wgru2m_ref, wgru2h_ref, bgru2_ref,
    bn1g_ref, bn1b_ref, bn2g_ref, bn2b_ref, bn3g_ref, bn3b_ref,
    l1w_ref, l1b_ref, l2w_ref, l2b_ref,
    out_ref,
):
    hp = wg1_ref.shape[0]                 # padded feature width (multiple of 128)
    a = a_ref[...]                        # [Np, Np] bf16 weighted adjacency
    msk = msk_ref[...]                    # [Np, 1]  f32 = row_mask / n_real

    def gated_conv(h, wg_ref, wm_ref, wh_ref, bgru_ref):
        hb = h.astype(jnp.bfloat16)
        # message = h @ W ; aggregate = A @ message  (dense form of scatter-add)
        m = jnp.dot(hb, wg_ref[...], preferred_element_type=jnp.float32)
        agg = jnp.dot(a, m.astype(jnp.bfloat16),
                      preferred_element_type=jnp.float32)
        # GRUCell: two matmuls produce [r_pre | z_pre | i_n | h_n] with r/z
        # contributions already summed; i_n and h_n kept in separate blocks.
        g = (jnp.dot(agg.astype(jnp.bfloat16), wm_ref[...],
                     preferred_element_type=jnp.float32)
             + jnp.dot(hb, wh_ref[...], preferred_element_type=jnp.float32)
             + bgru_ref[...])
        r = jax.nn.sigmoid(g[:, 0:hp])
        z = jax.nn.sigmoid(g[:, hp:2 * hp])
        n = jnp.tanh(g[:, 2 * hp:3 * hp] + r * g[:, 3 * hp:4 * hp])
        return n + z * (h - n)            # == (1 - z) * n + z * h

    def relu_bn(h, gamma, beta, eps=1e-5):
        # Training-mode BatchNorm1d fused with the preceding ReLU. One masked
        # pass of column sums; the mask zeroes padded rows and carries 1/N.
        h = jnp.maximum(h, 0.0)
        hm = h * msk
        mean = jnp.sum(hm, axis=0, keepdims=True)
        ex2 = jnp.sum(hm * h, axis=0, keepdims=True)
        inv = jax.lax.rsqrt(ex2 - mean * mean + eps)
        return gamma * (h - mean) * inv + beta

    h = x_ref[...]                                                 # [Np, HP] f32
    # ---- GatedGraphConv 1 + ReLU + BN1 ----
    h = gated_conv(h, wg1_ref, wgru1m_ref, wgru1h_ref, bgru1_ref)
    h = relu_bn(h, bn1g_ref[...], bn1b_ref[...])
    # ---- GatedGraphConv 2 + ReLU + BN2 ----
    h = gated_conv(h, wg2_ref, wgru2m_ref, wgru2h_ref, bgru2_ref)
    h = relu_bn(h, bn2g_ref[...], bn2b_ref[...])
    # ---- Linear1 + ReLU + BN3 ----
    h = jnp.dot(h.astype(jnp.bfloat16), l1w_ref[...],
                preferred_element_type=jnp.float32) + l1b_ref[...]
    h = relu_bn(h, bn3g_ref[...], bn3b_ref[...])
    # ---- Linear2 (lane-dense padded output slab) ----
    out_ref[...] = jnp.dot(h.astype(jnp.bfloat16), l2w_ref[...],
                           preferred_element_type=jnp.float32) + l2b_ref[...]


# -------------------------------- wrapper -------------------------------------
def gated_gcn_forward(x, edge_index, edge_attr, kparams, h_dim, output_dim=1):
    """Batched forward over G independent graphs.

    x: [G, N, in_dim] (in_dim <= h_dim), edge_index: [G, 2, E] int,
    edge_attr: [G, E]. kparams: output of pack_params().
    """
    G, N, in_dim = x.shape
    hp = kparams["wg1"].shape[0]
    outp = kparams["l2w"].shape[1]
    n_pad = _round_up(N, 8)
    assert in_dim <= h_dim <= hp

    # Zero-pad features (GatedGraphConv zero-pads up to out_channels) and rows.
    x_p = jnp.zeros((G, n_pad, hp), jnp.float32).at[:, :N, :in_dim].set(
        x.astype(jnp.float32))

    # Dense weighted adjacency per graph: A[dst, src] += w (scatter-add).
    # TODO(synk): for large/sparse graphs replace dense A with a CSR
    # scalar-prefetch gather + tiled (node-row x reduction) grid.
    def densify(ei, ew):
        return jnp.zeros((n_pad, n_pad), jnp.float32).at[ei[1], ei[0]].add(ew)
    a = jax.vmap(densify)(edge_index, edge_attr.astype(jnp.float32))
    a = a.astype(jnp.bfloat16)

    # Row mask folded with 1/N so BN statistics ignore padded node rows.
    msk = ((jnp.arange(n_pad) < N).astype(jnp.float32) / float(N))[:, None]

    weight_names = [
        "wg1", "wgru1_m", "wgru1_h", "bgru1",
        "wg2", "wgru2_m", "wgru2_h", "bgru2",
        "bn1_g", "bn1_b", "bn2_g", "bn2_b", "bn3_g", "bn3_b",
        "l1w", "l1b", "l2w", "l2b",
    ]
    weights = [kparams[k] for k in weight_names]

    def _const_spec(arr):
        nd = arr.ndim
        return pl.BlockSpec(arr.shape, lambda g, _nd=nd: (0,) * _nd)

    in_specs = [
        pl.BlockSpec((None, n_pad, hp), lambda g: (g, 0, 0)),      # x
        pl.BlockSpec((None, n_pad, n_pad), lambda g: (g, 0, 0)),   # A
        pl.BlockSpec((n_pad, 1), lambda g: (0, 0)),                # mask / N
    ] + [_const_spec(w) for w in weights]

    out = pl.pallas_call(
        gated_gcn_kernel,
        out_shape=jax.ShapeDtypeStruct((G, n_pad, outp), jnp.float32),
        grid=(G,),
        in_specs=in_specs,
        out_specs=pl.BlockSpec((None, n_pad, outp), lambda g: (g, 0, 0)),
        compiler_params=pltpu.CompilerParams(
            dimension_semantics=("parallel",),   # graphs -> 2 TCs on v7x
            vmem_limit_bytes=32 * 1024 * 1024),
    )(x_p, a, msk, *weights)

    out = out[:, :N, :output_dim]
    if output_dim == 1:
        out = out[..., 0]          # matches torch .squeeze() (last axis only)
    return out


# ---------------------------- parameter handling -------------------------------
def init_params(key, h_dim, output_dim=1):
    """Unpadded, torch-equivalent parameters (stored transposed for x @ W)."""
    H = h_dim
    ks = jax.random.split(key, 14)
    s = 1.0 / jnp.sqrt(jnp.float32(H))

    def u(k, shape):
        return jax.random.uniform(k, shape, jnp.float32, -s, s)

    return {
        # GatedGraphConv 1: propagation weight + GRUCell (gate order r | z | n)
        "wg1": u(ks[0], (H, H)),
        "wih1": u(ks[1], (H, 3 * H)), "whh1": u(ks[2], (H, 3 * H)),
        "bih1": u(ks[3], (3 * H,)), "bhh1": u(ks[4], (3 * H,)),
        # GatedGraphConv 2
        "wg2": u(ks[5], (H, H)),
        "wih2": u(ks[6], (H, 3 * H)), "whh2": u(ks[7], (H, 3 * H)),
        "bih2": u(ks[8], (3 * H,)), "bhh2": u(ks[9], (3 * H,)),
        # BatchNorm affine (fresh torch modules: gamma=1, beta=0)
        "bn1_g": jnp.ones((H,), jnp.float32), "bn1_b": jnp.zeros((H,), jnp.float32),
        "bn2_g": jnp.ones((H,), jnp.float32), "bn2_b": jnp.zeros((H,), jnp.float32),
        "bn3_g": jnp.ones((H,), jnp.float32), "bn3_b": jnp.zeros((H,), jnp.float32),
        # Linear layers, transposed for x @ W
        "l1w": u(ks[10], (H, H)), "l1b": u(ks[11], (H,)),
        "l2w": u(ks[12], (H, output_dim)), "l2b": u(ks[13], (output_dim,)),
    }


def pack_params(params, h_dim, output_dim=1):
    """Pad to lane-dense (128) shapes, fuse GRU gate matmuls into two
    [HP, 4*HP] weights (message-side / hidden-side), cast MXU weights to bf16.
    Zero padding keeps padded feature lanes identically zero."""
    H = h_dim
    hp = _round_up(max(H, 1), 128)
    outp = _round_up(max(output_dim, 1), 128)

    def pad2(w, rows, cols, dtype=jnp.float32):
        out = jnp.zeros((rows, cols), jnp.float32)
        out = out.at[:w.shape[0], :w.shape[1]].set(w)
        return out.astype(dtype)

    def fuse_gru(wih_t, whh_t, bih, bhh):
        # Column layout [r_pre | z_pre | i_n | h_n]; r/z contributions from the
        # message and hidden sides are summed by the matmul + add, while i_n and
        # h_n stay separate (needed for n = tanh(i_n + r*h_n)).
        wm = jnp.zeros((hp, 4 * hp), jnp.float32)
        wm = wm.at[0:H, 0:H].set(wih_t[:, 0:H])
        wm = wm.at[0:H, hp:hp + H].set(wih_t[:, H:2 * H])
        wm = wm.at[0:H, 2 * hp:2 * hp + H].set(wih_t[:, 2 * H:3 * H])
        wh = jnp.zeros((hp, 4 * hp), jnp.float32)
        wh = wh.at[0:H, 0:H].set(whh_t[:, 0:H])
        wh = wh.at[0:H, hp:hp + H].set(whh_t[:, H:2 * H])
        wh = wh.at[0:H, 3 * hp:3 * hp + H].set(whh_t[:, 2 * H:3 * H])
        b = jnp.zeros((1, 4 * hp), jnp.float32)
        b = b.at[0, 0:H].set(bih[0:H] + bhh[0:H])
        b = b.at[0, hp:hp + H].set(bih[H:2 * H] + bhh[H:2 * H])
        b = b.at[0, 2 * hp:2 * hp + H].set(bih[2 * H:3 * H])
        b = b.at[0, 3 * hp:3 * hp + H].set(bhh[2 * H:3 * H])
        return wm.astype(jnp.bfloat16), wh.astype(jnp.bfloat16), b

    wgru1_m, wgru1_h, bgru1 = fuse_gru(params["wih1"], params["whh1"],
                                       params["bih1"], params["bhh1"])
    wgru2_m, wgru2_h, bgru2 = fuse_gru(params["wih2"], params["whh2"],
                                       params["bih2"], params["bhh2"])
    row = lambda v: v[None, :]
    return {
        "wg1": pad2(params["wg1"], hp, hp, jnp.bfloat16),
        "wgru1_m": wgru1_m, "wgru1_h": wgru1_h, "bgru1": bgru1,
        "wg2": pad2(params["wg2"], hp, hp, jnp.bfloat16),
        "wgru2_m": wgru2_m, "wgru2_h": wgru2_h, "bgru2": bgru2,
        "bn1_g": pad2(row(params["bn1_g"]), 1, hp),
        "bn1_b": pad2(row(params["bn1_b"]), 1, hp),
        "bn2_g": pad2(row(params["bn2_g"]), 1, hp),
        "bn2_b": pad2(row(params["bn2_b"]), 1, hp),
        "bn3_g": pad2(row(params["bn3_g"]), 1, hp),
        "bn3_b": pad2(row(params["bn3_b"]), 1, hp),
        "l1w": pad2(params["l1w"], hp, hp, jnp.bfloat16),
        "l1b": pad2(row(params["l1b"]), 1, hp),
        "l2w": pad2(params["l2w"], hp, outp, jnp.bfloat16),
        "l2b": pad2(row(params["l2b"]), 1, outp),
    }


# ----------------------------------- main --------------------------------------
if __name__ == "__main__":
    H_DIM = 4
    OUTPUT_DIM = 1
    N = 16        # nodes per graph
    E = 32        # edges per graph
    G = 4         # batch of independent graphs (one "parallel" grid step each)

    key = jax.random.PRNGKey(0)
    k_x, k_src, k_dst, k_w, k_p = jax.random.split(key, 5)

    x = jax.random.normal(k_x, (G, N, H_DIM), dtype=jnp.float32)
    edge_index = jnp.stack([
        jax.random.randint(k_src, (G, E), 0, N),
        jax.random.randint(k_dst, (G, E), 0, N),
    ], axis=1).astype(jnp.int32)                       # [G, 2, E]
    edge_attr = jax.random.uniform(k_w, (G, E), dtype=jnp.float32)

    params = init_params(k_p, H_DIM, OUTPUT_DIM)
    kparams = pack_params(params, H_DIM, OUTPUT_DIM)

    fwd = jax.jit(functools.partial(
        gated_gcn_forward, h_dim=H_DIM, output_dim=OUTPUT_DIM))
    out = fwd(x, edge_index, edge_attr, kparams)
    jax.block_until_ready(out)

    assert out.shape == (G, N), out.shape
    assert bool(jnp.all(jnp.isfinite(out)))
    print("KERNEL_OK")
</pallas_src>

<mosaic_0001>
module attributes {stable_mosaic.version = 11 : i64} {
  func.func private @main(%arg0: i32) attributes {dimension_semantics = [#tpu.dimension_semantics<core_parallel>], iteration_bounds = array<i64: 2>, tpu.core_type = #tpu.core_type<sc_scalar_subcore>, window_params = []} {
    return
  }
}

module attributes {stable_mosaic.version = 11 : i64} {
  func.func private @main(%arg0: i32) attributes {dimension_semantics = [#tpu.dimension_semantics<core_parallel>], iteration_bounds = array<i64: 2>, tpu.core_type = #tpu.core_type<sc_scalar_subcore>, window_params = []} {
    return
  }
}

module attributes {stable_mosaic.version = 11 : i64} {
  func.func @gated_gcn_kernel(%arg0: i32, %arg1: memref<1x16x128xf32, #tpu.memory_space<vmem>>, %arg2: memref<1x16x16xbf16, #tpu.memory_space<vmem>>, %arg3: memref<16x1xf32, #tpu.memory_space<vmem>>, %arg4: memref<128x128xbf16, #tpu.memory_space<vmem>>, %arg5: memref<128x512xbf16, #tpu.memory_space<vmem>>, %arg6: memref<128x512xbf16, #tpu.memory_space<vmem>>, %arg7: memref<1x512xf32, #tpu.memory_space<vmem>>, %arg8: memref<128x128xbf16, #tpu.memory_space<vmem>>, %arg9: memref<128x512xbf16, #tpu.memory_space<vmem>>, %arg10: memref<128x512xbf16, #tpu.memory_space<vmem>>, %arg11: memref<1x512xf32, #tpu.memory_space<vmem>>, %arg12: memref<1x128xf32, #tpu.memory_space<vmem>>, %arg13: memref<1x128xf32, #tpu.memory_space<vmem>>, %arg14: memref<1x128xf32, #tpu.memory_space<vmem>>, %arg15: memref<1x128xf32, #tpu.memory_space<vmem>>, %arg16: memref<1x128xf32, #tpu.memory_space<vmem>>, %arg17: memref<1x128xf32, #tpu.memory_space<vmem>>, %arg18: memref<128x128xbf16, #tpu.memory_space<vmem>>, %arg19: memref<1x128xf32, #tpu.memory_space<vmem>>, %arg20: memref<128x128xbf16, #tpu.memory_space<vmem>>, %arg21: memref<1x128xf32, #tpu.memory_space<vmem>>, %arg22: memref<1x16x128xf32, #tpu.memory_space<vmem>>) attributes {dimension_semantics = [#tpu.dimension_semantics<parallel>], iteration_bounds = array<i64: 4>, scalar_prefetch = 0 : i64, scratch_operands = 0 : i64, tpu.core_type = #tpu.core_type<tc>, window_params = [{transform_indices = @transform_0, window_bounds = array<i64: 1, 16, 128>}, {transform_indices = @transform_1, window_bounds = array<i64: 1, 16, 16>}, {pipeline_mode = #tpu.pipeline_mode<synchronous>, transform_indices = @transform_2, window_bounds = array<i64: 16, 1>}, {pipeline_mode = #tpu.pipeline_mode<synchronous>, transform_indices = @transform_3, window_bounds = array<i64: 128, 128>}, {pipeline_mode = #tpu.pipeline_mode<synchronous>, transform_indices = @transform_4, window_bounds = array<i64: 128, 512>}, {pipeline_mode = #tpu.pipeline_mode<synchronous>, transform_indices = @transform_5, window_bounds = array<i64: 128, 512>}, {pipeline_mode = #tpu.pipeline_mode<synchronous>, transform_indices = @transform_6, window_bounds = array<i64: 1, 512>}, {pipeline_mode = #tpu.pipeline_mode<synchronous>, transform_indices = @transform_7, window_bounds = array<i64: 128, 128>}, {pipeline_mode = #tpu.pipeline_mode<synchronous>, transform_indices = @transform_8, window_bounds = array<i64: 128, 512>}, {pipeline_mode = #tpu.pipeline_mode<synchronous>, transform_indices = @transform_9, window_bounds = array<i64: 128, 512>}, {pipeline_mode = #tpu.pipeline_mode<synchronous>, transform_indices = @transform_10, window_bounds = array<i64: 1, 512>}, {pipeline_mode = #tpu.pipeline_mode<synchronous>, transform_indices = @transform_11, window_bounds = array<i64: 1, 128>}, {pipeline_mode = #tpu.pipeline_mode<synchronous>, transform_indices = @transform_12, window_bounds = array<i64: 1, 128>}, {pipeline_mode = #tpu.pipeline_mode<synchronous>, transform_indices = @transform_13, window_bounds = array<i64: 1, 128>}, {pipeline_mode = #tpu.pipeline_mode<synchronous>, transform_indices = @transform_14, window_bounds = array<i64: 1, 128>}, {pipeline_mode = #tpu.pipeline_mode<synchronous>, transform_indices = @transform_15, window_bounds = array<i64: 1, 128>}, {pipeline_mode = #tpu.pipeline_mode<synchronous>, transform_indices = @transform_16, window_bounds = array<i64: 1, 128>}, {pipeline_mode = #tpu.pipeline_mode<synchronous>, transform_indices = @transform_17, window_bounds = array<i64: 128, 128>}, {pipeline_mode = #tpu.pipeline_mode<synchronous>, transform_indices = @transform_18, window_bounds = array<i64: 1, 128>}, {pipeline_mode = #tpu.pipeline_mode<synchronous>, transform_indices = @transform_19, window_bounds = array<i64: 128, 128>}, {pipeline_mode = #tpu.pipeline_mode<synchronous>, transform_indices = @transform_20, window_bounds = array<i64: 1, 128>}, {transform_indices = @transform_21, window_bounds = array<i64: 1, 16, 128>}]} {
    %c0 = arith.constant 0 : index
    %c0_0 = arith.constant 0 : index
    %c0_1 = arith.constant 0 : index
    %0 = vector.load %arg2[%c0, %c0_0, %c0_1] : memref<1x16x16xbf16, #tpu.memory_space<vmem>>, vector<1x16x16xbf16>
    %1 = vector.shape_cast %0 : vector<1x16x16xbf16> to vector<16x16xbf16>
    %c0_2 = arith.constant 0 : index
    %c0_3 = arith.constant 0 : index
    %2 = vector.load %arg3[%c0_2, %c0_3] : memref<16x1xf32, #tpu.memory_space<vmem>>, vector<16x1xf32>
    %c0_4 = arith.constant 0 : index
    %c0_5 = arith.constant 0 : index
    %c0_6 = arith.constant 0 : index
    %3 = vector.load %arg1[%c0_4, %c0_5, %c0_6] : memref<1x16x128xf32, #tpu.memory_space<vmem>>, vector<1x16x128xf32>
    %4 = vector.shape_cast %3 : vector<1x16x128xf32> to vector<16x128xf32>
    %5 = arith.truncf %4 : vector<16x128xf32> to vector<16x128xbf16>
    %c0_7 = arith.constant 0 : index
    %c0_8 = arith.constant 0 : index
    %6 = vector.load %arg4[%c0_7, %c0_8] : memref<128x128xbf16, #tpu.memory_space<vmem>>, vector<128x128xbf16>
    %cst = arith.constant dense<0.000000e+00> : vector<16x128xf32>
    %7 = tpu.matmul %5, %6, %cst {dimension_numbers = #tpu.dot_dimension_numbers<[1], [0], [0], [1], [0, 0, 1, 1], [], []>} : vector<16x128xbf16>, vector<128x128xbf16>, vector<16x128xf32> -> vector<16x128xf32>
    %8 = arith.truncf %7 : vector<16x128xf32> to vector<16x128xbf16>
    %cst_9 = arith.constant dense<0.000000e+00> : vector<16x128xf32>
    %9 = tpu.matmul %1, %8, %cst_9 {dimension_numbers = #tpu.dot_dimension_numbers<[1], [0], [0], [1], [0, 0, 1, 1], [], []>} : vector<16x16xbf16>, vector<16x128xbf16>, vector<16x128xf32> -> vector<16x128xf32>
    %10 = arith.truncf %9 : vector<16x128xf32> to vector<16x128xbf16>
    %c0_10 = arith.constant 0 : index
    %c0_11 = arith.constant 0 : index
    %11 = vector.load %arg5[%c0_10, %c0_11] : memref<128x512xbf16, #tpu.memory_space<vmem>>, vector<128x512xbf16>
    %cst_12 = arith.constant dense<0.000000e+00> : vector<16x512xf32>
    %12 = tpu.matmul %10, %11, %cst_12 {dimension_numbers = #tpu.dot_dimension_numbers<[1], [0], [0], [1], [0, 0, 1, 1], [], []>} : vector<16x128xbf16>, vector<128x512xbf16>, vector<16x512xf32> -> vector<16x512xf32>
    %c0_13 = arith.constant 0 : index
    %c0_14 = arith.constant 0 : index
    %13 = vector.load %arg6[%c0_13, %c0_14] : memref<128x512xbf16, #tpu.memory_space<vmem>>, vector<128x512xbf16>
    %cst_15 = arith.constant dense<0.000000e+00> : vector<16x512xf32>
    %14 = tpu.matmul %5, %13, %cst_15 {dimension_numbers = #tpu.dot_dimension_numbers<[1], [0], [0], [1], [0, 0, 1, 1], [], []>} : vector<16x128xbf16>, vector<128x512xbf16>, vector<16x512xf32> -> vector<16x512xf32>
    %15 = arith.addf %12, %14 : vector<16x512xf32>
    %c0_16 = arith.constant 0 : index
    %c0_17 = arith.constant 0 : index
    %16 = vector.load %arg7[%c0_16, %c0_17] : memref<1x512xf32, #tpu.memory_space<vmem>>, vector<1x512xf32>
    %17 = vector.broadcast %16 : vector<1x512xf32> to vector<16x512xf32>
    %18 = arith.addf %15, %17 : vector<16x512xf32>
    %19 = vector.extract_strided_slice %18 {offsets = [0, 0], sizes = [16, 128], strides = [1, 1]} : vector<16x512xf32> to vector<16x128xf32>
    %20 = arith.negf %19 : vector<16x128xf32>
    %21 = math.exp %20 : vector<16x128xf32>
    %cst_18 = arith.constant 1.000000e+00 : f32
    %22 = vector.broadcast %cst_18 : f32 to vector<16x128xf32>
    %23 = arith.addf %22, %21 : vector<16x128xf32>
    %24 = arith.divf %22, %23 : vector<16x128xf32>
    %25 = vector.extract_strided_slice %18 {offsets = [0, 128], sizes = [16, 128], strides = [1, 1]} : vector<16x512xf32> to vector<16x128xf32>
    %26 = arith.negf %25 : vector<16x128xf32>
    %27 = math.exp %26 : vector<16x128xf32>
    %cst_19 = arith.constant 1.000000e+00 : f32
    %28 = vector.broadcast %cst_19 : f32 to vector<16x128xf32>
    %29 = arith.addf %28, %27 : vector<16x128xf32>
    %30 = arith.divf %28, %29 : vector<16x128xf32>
    %31 = vector.extract_strided_slice %18 {offsets = [0, 256], sizes = [16, 128], strides = [1, 1]} : vector<16x512xf32> to vector<16x128xf32>
    %32 = vector.extract_strided_slice %18 {offsets = [0, 384], sizes = [16, 128], strides = [1, 1]} : vector<16x512xf32> to vector<16x128xf32>
    %33 = arith.mulf %24, %32 : vector<16x128xf32>
    %34 = arith.addf %31, %33 : vector<16x128xf32>
    %35 = math.tanh %34 : vector<16x128xf32>
    %36 = arith.subf %4, %35 : vector<16x128xf32>
    %37 = arith.mulf %30, %36 : vector<16x128xf32>
    %38 = arith.addf %35, %37 : vector<16x128xf32>
    %c0_20 = arith.constant 0 : index
    %c0_21 = arith.constant 0 : index
    %39 = vector.load %arg12[%c0_20, %c0_21] : memref<1x128xf32, #tpu.memory_space<vmem>>, vector<1x128xf32>
    %c0_22 = arith.constant 0 : index
    %c0_23 = arith.constant 0 : index
    %40 = vector.load %arg13[%c0_22, %c0_23] : memref<1x128xf32, #tpu.memory_space<vmem>>, vector<1x128xf32>
    %cst_24 = arith.constant 0.000000e+00 : f32
    %41 = vector.broadcast %cst_24 : f32 to vector<16x128xf32>
    %42 = arith.maximumf %38, %41 : vector<16x128xf32>
    %43 = vector.broadcast %2 : vector<16x1xf32> to vector<16x128xf32>
    %44 = arith.mulf %42, %43 : vector<16x128xf32>
    %cst_25 = arith.constant dense<0.000000e+00> : vector<128xf32>
    %45 = vector.multi_reduction <add>, %44, %cst_25 [0] : vector<16x128xf32> to vector<128xf32>
    %46 = vector.shape_cast %45 : vector<128xf32> to vector<1x128xf32>
    %47 = arith.mulf %44, %42 : vector<16x128xf32>
    %cst_26 = arith.constant dense<0.000000e+00> : vector<128xf32>
    %48 = vector.multi_reduction <add>, %47, %cst_26 [0] : vector<16x128xf32> to vector<128xf32>
    %49 = vector.shape_cast %48 : vector<128xf32> to vector<1x128xf32>
    %50 = arith.mulf %46, %46 : vector<1x128xf32>
    %51 = arith.subf %49, %50 : vector<1x128xf32>
    %cst_27 = arith.constant 9.99999974E-6 : f32
    %52 = vector.broadcast %cst_27 : f32 to vector<1x128xf32>
    %53 = arith.addf %51, %52 : vector<1x128xf32>
    %54 = math.rsqrt %53 : vector<1x128xf32>
    %55 = vector.broadcast %46 : vector<1x128xf32> to vector<16x128xf32>
    %56 = arith.subf %42, %55 : vector<16x128xf32>
    %57 = vector.broadcast %39 : vector<1x128xf32> to vector<16x128xf32>
    %58 = arith.mulf %57, %56 : vector<16x128xf32>
    %59 = vector.broadcast %54 : vector<1x128xf32> to vector<16x128xf32>
    %60 = arith.mulf %58, %59 : vector<16x128xf32>
    %61 = vector.broadcast %40 : vector<1x128xf32> to vector<16x128xf32>
    %62 = arith.addf %60, %61 : vector<16x128xf32>
    %63 = arith.truncf %62 : vector<16x128xf32> to vector<16x128xbf16>
    %c0_28 = arith.constant 0 : index
    %c0_29 = arith.constant 0 : index
    %64 = vector.load %arg8[%c0_28, %c0_29] : memref<128x128xbf16, #tpu.memory_space<vmem>>, vector<128x128xbf16>
    %cst_30 = arith.constant dense<0.000000e+00> : vector<16x128xf32>
    %65 = tpu.matmul %63, %64, %cst_30 {dimension_numbers = #tpu.dot_dimension_numbers<[1], [0], [0], [1], [0, 0, 1, 1], [], []>} : vector<16x128xbf16>, vector<128x128xbf16>, vector<16x128xf32> -> vector<16x128xf32>
    %66 = arith.truncf %65 : vector<16x128xf32> to vector<16x128xbf16>
    %cst_31 = arith.constant dense<0.000000e+00> : vector<16x128xf32>
    %67 = tpu.matmul %1, %66, %cst_31 {dimension_numbers = #tpu.dot_dimension_numbers<[1], [0], [0], [1], [0, 0, 1, 1], [], []>} : vector<16x16xbf16>, vector<16x128xbf16>, vector<16x128xf32> -> vector<16x128xf32>
    %68 = arith.truncf %67 : vector<16x128xf32> to vector<16x128xbf16>
    %c0_32 = arith.constant 0 : index
    %c0_33 = arith.constant 0 : index
    %69 = vector.load %arg9[%c0_32, %c0_33] : memref<128x512xbf16, #tpu.memory_space<vmem>>, vector<128x512xbf16>
    %cst_34 = arith.constant dense<0.000000e+00> : vector<16x512xf32>
    %70 = tpu.matmul %68, %69, %cst_34 {dimension_numbers = #tpu.dot_dimension_numbers<[1], [0], [0], [1], [0, 0, 1, 1], [], []>} : vector<16x128xbf16>, vector<128x512xbf16>, vector<16x512xf32> -> vector<16x512xf32>
    %c0_35 = arith.constant 0 : index
    %c0_36 = arith.constant 0 : index
    %71 = vector.load %arg10[%c0_35, %c0_36] : memref<128x512xbf16, #tpu.memory_space<vmem>>, vector<128x512xbf16>
    %cst_37 = arith.constant dense<0.000000e+00> : vector<16x512xf32>
    %72 = tpu.matmul %63, %71, %cst_37 {dimension_numbers = #tpu.dot_dimension_numbers<[1], [0], [0], [1], [0, 0, 1, 1], [], []>} : vector<16x128xbf16>, vector<128x512xbf16>, vector<16x512xf32> -> vector<16x512xf32>
    %73 = arith.addf %70, %72 : vector<16x512xf32>
    %c0_38 = arith.constant 0 : index
    %c0_39 = arith.constant 0 : index
    %74 = vector.load %arg11[%c0_38, %c0_39] : memref<1x512xf32, #tpu.memory_space<vmem>>, vector<1x512xf32>
    %75 = vector.broadcast %74 : vector<1x512xf32> to vector<16x512xf32>
    %76 = arith.addf %73, %75 : vector<16x512xf32>
    %77 = vector.extract_strided_slice %76 {offsets = [0, 0], sizes = [16, 128], strides = [1, 1]} : vector<16x512xf32> to vector<16x128xf32>
    %78 = arith.negf %77 : vector<16x128xf32>
    %79 = math.exp %78 : vector<16x128xf32>
    %cst_40 = arith.constant 1.000000e+00 : f32
    %80 = vector.broadcast %cst_40 : f32 to vector<16x128xf32>
    %81 = arith.addf %80, %79 : vector<16x128xf32>
    %82 = arith.divf %80, %81 : vector<16x128xf32>
    %83 = vector.extract_strided_slice %76 {offsets = [0, 128], sizes = [16, 128], strides = [1, 1]} : vector<16x512xf32> to vector<16x128xf32>
    %84 = arith.negf %83 : vector<16x128xf32>
    %85 = math.exp %84 : vector<16x128xf32>
    %cst_41 = arith.constant 1.000000e+00 : f32
    %86 = vector.broadcast %cst_41 : f32 to vector<16x128xf32>
    %87 = arith.addf %86, %85 : vector<16x128xf32>
    %88 = arith.divf %86, %87 : vector<16x128xf32>
    %89 = vector.extract_strided_slice %76 {offsets = [0, 256], sizes = [16, 128], strides = [1, 1]} : vector<16x512xf32> to vector<16x128xf32>
    %90 = vector.extract_strided_slice %76 {offsets = [0, 384], sizes = [16, 128], strides = [1, 1]} : vector<16x512xf32> to vector<16x128xf32>
    %91 = arith.mulf %82, %90 : vector<16x128xf32>
    %92 = arith.addf %89, %91 : vector<16x128xf32>
    %93 = math.tanh %92 : vector<16x128xf32>
    %94 = arith.subf %62, %93 : vector<16x128xf32>
    %95 = arith.mulf %88, %94 : vector<16x128xf32>
    %96 = arith.addf %93, %95 : vector<16x128xf32>
    %c0_42 = arith.constant 0 : index
    %c0_43 = arith.constant 0 : index
    %97 = vector.load %arg14[%c0_42, %c0_43] : memref<1x128xf32, #tpu.memory_space<vmem>>, vector<1x128xf32>
    %c0_44 = arith.constant 0 : index
    %c0_45 = arith.constant 0 : index
    %98 = vector.load %arg15[%c0_44, %c0_45] : memref<1x128xf32, #tpu.memory_space<vmem>>, vector<1x128xf32>
    %cst_46 = arith.constant 0.000000e+00 : f32
    %99 = vector.broadcast %cst_46 : f32 to vector<16x128xf32>
    %100 = arith.maximumf %96, %99 : vector<16x128xf32>
    %101 = vector.broadcast %2 : vector<16x1xf32> to vector<16x128xf32>
    %102 = arith.mulf %100, %101 : vector<16x128xf32>
    %cst_47 = arith.constant dense<0.000000e+00> : vector<128xf32>
    %103 = vector.multi_reduction <add>, %102, %cst_47 [0] : vector<16x128xf32> to vector<128xf32>
    %104 = vector.shape_cast %103 : vector<128xf32> to vector<1x128xf32>
    %105 = arith.mulf %102, %100 : vector<16x128xf32>
    %cst_48 = arith.constant dense<0.000000e+00> : vector<128xf32>
    %106 = vector.multi_reduction <add>, %105, %cst_48 [0] : vector<16x128xf32> to vector<128xf32>
    %107 = vector.shape_cast %106 : vector<128xf32> to vector<1x128xf32>
    %108 = arith.mulf %104, %104 : vector<1x128xf32>
    %109 = arith.subf %107, %108 : vector<1x128xf32>
    %cst_49 = arith.constant 9.99999974E-6 : f32
    %110 = vector.broadcast %cst_49 : f32 to vector<1x128xf32>
    %111 = arith.addf %109, %110 : vector<1x128xf32>
    %112 = math.rsqrt %111 : vector<1x128xf32>
    %113 = vector.broadcast %104 : vector<1x128xf32> to vector<16x128xf32>
    %114 = arith.subf %100, %113 : vector<16x128xf32>
    %115 = vector.broadcast %97 : vector<1x128xf32> to vector<16x128xf32>
    %116 = arith.mulf %115, %114 : vector<16x128xf32>
    %117 = vector.broadcast %112 : vector<1x128xf32> to vector<16x128xf32>
    %118 = arith.mulf %116, %117 : vector<16x128xf32>
    %119 = vector.broadcast %98 : vector<1x128xf32> to vector<16x128xf32>
    %120 = arith.addf %118, %119 : vector<16x128xf32>
    %121 = arith.truncf %120 : vector<16x128xf32> to vector<16x128xbf16>
    %c0_50 = arith.constant 0 : index
    %c0_51 = arith.constant 0 : index
    %122 = vector.load %arg18[%c0_50, %c0_51] : memref<128x128xbf16, #tpu.memory_space<vmem>>, vector<128x128xbf16>
    %cst_52 = arith.constant dense<0.000000e+00> : vector<16x128xf32>
    %123 = tpu.matmul %121, %122, %cst_52 {dimension_numbers = #tpu.dot_dimension_numbers<[1], [0], [0], [1], [0, 0, 1, 1], [], []>} : vector<16x128xbf16>, vector<128x128xbf16>, vector<16x128xf32> -> vector<16x128xf32>
    %c0_53 = arith.constant 0 : index
    %c0_54 = arith.constant 0 : index
    %124 = vector.load %arg19[%c0_53, %c0_54] : memref<1x128xf32, #tpu.memory_space<vmem>>, vector<1x128xf32>
    %125 = vector.broadcast %124 : vector<1x128xf32> to vector<16x128xf32>
    %126 = arith.addf %123, %125 : vector<16x128xf32>
    %c0_55 = arith.constant 0 : index
    %c0_56 = arith.constant 0 : index
    %127 = vector.load %arg16[%c0_55, %c0_56] : memref<1x128xf32, #tpu.memory_space<vmem>>, vector<1x128xf32>
    %c0_57 = arith.constant 0 : index
    %c0_58 = arith.constant 0 : index
    %128 = vector.load %arg17[%c0_57, %c0_58] : memref<1x128xf32, #tpu.memory_space<vmem>>, vector<1x128xf32>
    %cst_59 = arith.constant 0.000000e+00 : f32
    %129 = vector.broadcast %cst_59 : f32 to vector<16x128xf32>
    %130 = arith.maximumf %126, %129 : vector<16x128xf32>
    %131 = vector.broadcast %2 : vector<16x1xf32> to vector<16x128xf32>
    %132 = arith.mulf %130, %131 : vector<16x128xf32>
    %cst_60 = arith.constant dense<0.000000e+00> : vector<128xf32>
    %133 = vector.multi_reduction <add>, %132, %cst_60 [0] : vector<16x128xf32> to vector<128xf32>
    %134 = vector.shape_cast %133 : vector<128xf32> to vector<1x128xf32>
    %135 = arith.mulf %132, %130 : vector<16x128xf32>
    %cst_61 = arith.constant dense<0.000000e+00> : vector<128xf32>
    %136 = vector.multi_reduction <add>, %135, %cst_61 [0] : vector<16x128xf32> to vector<128xf32>
    %137 = vector.shape_cast %136 : vector<128xf32> to vector<1x128xf32>
    %138 = arith.mulf %134, %134 : vector<1x128xf32>
    %139 = arith.subf %137, %138 : vector<1x128xf32>
    %cst_62 = arith.constant 9.99999974E-6 : f32
    %140 = vector.broadcast %cst_62 : f32 to vector<1x128xf32>
    %141 = arith.addf %139, %140 : vector<1x128xf32>
    %142 = math.rsqrt %141 : vector<1x128xf32>
    %143 = vector.broadcast %134 : vector<1x128xf32> to vector<16x128xf32>
    %144 = arith.subf %130, %143 : vector<16x128xf32>
    %145 = vector.broadcast %127 : vector<1x128xf32> to vector<16x128xf32>
    %146 = arith.mulf %145, %144 : vector<16x128xf32>
    %147 = vector.broadcast %142 : vector<1x128xf32> to vector<16x128xf32>
    %148 = arith.mulf %146, %147 : vector<16x128xf32>
    %149 = vector.broadcast %128 : vector<1x128xf32> to vector<16x128xf32>
    %150 = arith.addf %148, %149 : vector<16x128xf32>
    %151 = arith.truncf %150 : vector<16x128xf32> to vector<16x128xbf16>
    %c0_63 = arith.constant 0 : index
    %c0_64 = arith.constant 0 : index
    %152 = vector.load %arg20[%c0_63, %c0_64] : memref<128x128xbf16, #tpu.memory_space<vmem>>, vector<128x128xbf16>
    %cst_65 = arith.constant dense<0.000000e+00> : vector<16x128xf32>
    %153 = tpu.matmul %151, %152, %cst_65 {dimension_numbers = #tpu.dot_dimension_numbers<[1], [0], [0], [1], [0, 0, 1, 1], [], []>} : vector<16x128xbf16>, vector<128x128xbf16>, vector<16x128xf32> -> vector<16x128xf32>
    %c0_66 = arith.constant 0 : index
    %c0_67 = arith.constant 0 : index
    %154 = vector.load %arg21[%c0_66, %c0_67] : memref<1x128xf32, #tpu.memory_space<vmem>>, vector<1x128xf32>
    %155 = vector.broadcast %154 : vector<1x128xf32> to vector<16x128xf32>
    %156 = arith.addf %153, %155 : vector<16x128xf32>
    %c0_68 = arith.constant 0 : index
    %c0_69 = arith.constant 0 : index
    %c0_70 = arith.constant 0 : index
    %157 = vector.load %arg22[%c0_68, %c0_69, %c0_70] : memref<1x16x128xf32, #tpu.memory_space<vmem>>, vector<1x16x128xf32>
    %158 = vector.shape_cast %157 : vector<1x16x128xf32> to vector<16x128xf32>
    %159 = vector.shape_cast %156 : vector<16x128xf32> to vector<1x16x128xf32>
    tpu.vector_store %arg22[%c0_68, %c0_69, %c0_70], %159 {strides = array<i32>} : memref<1x16x128xf32, #tpu.memory_space<vmem>>, vector<1x16x128xf32>,
    return
  }
  func.func @transform_0(%arg0: i32) -> (i32, i32, i32) {
    %c0_i32 = arith.constant 0 : i32
    %c0_i32_0 = arith.constant 0 : i32
    %c0_i32_1 = arith.constant 0 : i32
    return %arg0, %c0_i32, %c0_i32_0 : i32, i32, i32
  }
  func.func @transform_1(%arg0: i32) -> (i32, i32, i32) {
    %c0_i32 = arith.constant 0 : i32
    %c0_i32_0 = arith.constant 0 : i32
    %c0_i32_1 = arith.constant 0 : i32
    return %arg0, %c0_i32, %c0_i32_0 : i32, i32, i32
  }
  func.func @transform_2(%arg0: i32) -> (i32, i32) {
    %c0_i32 = arith.constant 0 : i32
    %c0_i32_0 = arith.constant 0 : i32
    %c0_i32_1 = arith.constant 0 : i32
    return %c0_i32, %c0_i32_0 : i32, i32
  }
  func.func @transform_3(%arg0: i32) -> (i32, i32) {
    %c0_i32 = arith.constant 0 : i32
    %c0_i32_0 = arith.constant 0 : i32
    %c0_i32_1 = arith.constant 0 : i32
    return %c0_i32, %c0_i32_0 : i32, i32
  }
  func.func @transform_4(%arg0: i32) -> (i32, i32) {
    %c0_i32 = arith.constant 0 : i32
    %c0_i32_0 = arith.constant 0 : i32
    %c0_i32_1 = arith.constant 0 : i32
    return %c0_i32, %c0_i32_0 : i32, i32
  }
  func.func @transform_5(%arg0: i32) -> (i32, i32) {
    %c0_i32 = arith.constant 0 : i32
    %c0_i32_0 = arith.constant 0 : i32
    %c0_i32_1 = arith.constant 0 : i32
    return %c0_i32, %c0_i32_0 : i32, i32
  }
  func.func @transform_6(%arg0: i32) -> (i32, i32) {
    %c0_i32 = arith.constant 0 : i32
    %c0_i32_0 = arith.constant 0 : i32
    %c0_i32_1 = arith.constant 0 : i32
    return %c0_i32, %c0_i32_0 : i32, i32
  }
  func.func @transform_7(%arg0: i32) -> (i32, i32) {
    %c0_i32 = arith.constant 0 : i32
    %c0_i32_0 = arith.constant 0 : i32
    %c0_i32_1 = arith.constant 0 : i32
    return %c0_i32, %c0_i32_0 : i32, i32
  }
  func.func @transform_8(%arg0: i32) -> (i32, i32) {
    %c0_i32 = arith.constant 0 : i32
    %c0_i32_0 = arith.constant 0 : i32
    %c0_i32_1 = arith.constant 0 : i32
    return %c0_i32, %c0_i32_0 : i32, i32
  }
  func.func @transform_9(%arg0: i32) -> (i32, i32) {
    %c0_i32 = arith.constant 0 : i32
    %c0_i32_0 = arith.constant 0 : i32
    %c0_i32_1 = arith.constant 0 : i32
    return %c0_i32, %c0_i32_0 : i32, i32
  }
  func.func @transform_10(%arg0: i32) -> (i32, i32) {
    %c0_i32 = arith.constant 0 : i32
    %c0_i32_0 = arith.constant 0 : i32
    %c0_i32_1 = arith.constant 0 : i32
    return %c0_i32, %c0_i32_0 : i32, i32
  }
  func.func @transform_11(%arg0: i32) -> (i32, i32) {
    %c0_i32 = arith.constant 0 : i32
    %c0_i32_0 = arith.constant 0 : i32
    %c0_i32_1 = arith.constant 0 : i32
    return %c0_i32, %c0_i32_0 : i32, i32
  }
  func.func @transform_12(%arg0: i32) -> (i32, i32) {
    %c0_i32 = arith.constant 0 : i32
    %c0_i32_0 = arith.constant 0 : i32
    %c0_i32_1 = arith.constant 0 : i32
    return %c0_i32, %c0_i32_0 : i32, i32
  }
  func.func @transform_13(%arg0: i32) -> (i32, i32) {
    %c0_i32 = arith.constant 0 : i32
    %c0_i32_0 = arith.constant 0 : i32
    %c0_i32_1 = arith.constant 0 : i32
    return %c0_i32, %c0_i32_0 : i32, i32
  }
  func.func @transform_14(%arg0: i32) -> (i32, i32) {
    %c0_i32 = arith.constant 0 : i32
    %c0_i32_0 = arith.constant 0 : i32
    %c0_i32_1 = arith.constant 0 : i32
    return %c0_i32, %c0_i32_0 : i32, i32
  }
  func.func @transform_15(%arg0: i32) -> (i32, i32) {
    %c0_i32 = arith.constant 0 : i32
    %c0_i32_0 = arith.constant 0 : i32
    %c0_i32_1 = arith.constant 0 : i32
    return %c0_i32, %c0_i32_0 : i32, i32
  }
  func.func @transform_16(%arg0: i32) -> (i32, i32) {
    %c0_i32 = arith.constant 0 : i32
    %c0_i32_0 = arith.constant 0 : i32
    %c0_i32_1 = arith.constant 0 : i32
    return %c0_i32, %c0_i32_0 : i32, i32
  }
  func.func @transform_17(%arg0: i32) -> (i32, i32) {
    %c0_i32 = arith.constant 0 : i32
    %c0_i32_0 = arith.constant 0 : i32
    %c0_i32_1 = arith.constant 0 : i32
    return %c0_i32, %c0_i32_0 : i32, i32
  }
  func.func @transform_18(%arg0: i32) -> (i32, i32) {
    %c0_i32 = arith.constant 0 : i32
    %c0_i32_0 = arith.constant 0 : i32
    %c0_i32_1 = arith.constant 0 : i32
    return %c0_i32, %c0_i32_0 : i32, i32
  }
  func.func @transform_19(%arg0: i32) -> (i32, i32) {
    %c0_i32 = arith.constant 0 : i32
    %c0_i32_0 = arith.constant 0 : i32
    %c0_i32_1 = arith.constant 0 : i32
    return %c0_i32, %c0_i32_0 : i32, i32
  }
  func.func @transform_20(%arg0: i32) -> (i32, i32) {
    %c0_i32 = arith.constant 0 : i32
    %c0_i32_0 = arith.constant 0 : i32
    %c0_i32_1 = arith.constant 0 : i32
    return %c0_i32, %c0_i32_0 : i32, i32
  }
  func.func @transform_21(%arg0: i32) -> (i32, i32, i32) {
    %c0_i32 = arith.constant 0 : i32
    %c0_i32_0 = arith.constant 0 : i32
    %c0_i32_1 = arith.constant 0 : i32
    return %arg0, %c0_i32, %c0_i32_0 : i32, i32, i32
  }
}

</mosaic_0001>

<bundles_post_ra>
// kernel: gated_gcn_forward.1
= control target key start
LH: loop header
LB: loop body
LE: loop exit
PB: predicated region body
PF: predicated region fallthrough
CT: control target
= control target key end

     0   :  { %s4091_s0 = inlined_call_operand.vmem [shape: f32[4,16,128], index: 0, kind: input, shape index: {}]   ;;  %s4092_s1 = inlined_call_operand.vmem [shape: bf16[4,16,16], index: 1, kind: input, shape index: {}]   ;;  %s4093_s2 = inlined_call_operand.vmem [shape: f32[16,1], index: 2, kind: input, shape index: {}]   ;;  %s4094_s3 = inlined_call_operand.vmem [shape: bf16[128,128], index: 3, kind: input, shape index: {}]   ;;  %s4095_s4 = inlined_call_operand.vmem [shape: bf16[128,512], index: 4, kind: input, shape index: {}]   ;;  %s4096_s5 = inlined_call_operand.vmem [shape: bf16[128,512], index: 5, kind: input, shape index: {}]   ;;  %s4097_s6 = inlined_call_operand.vmem [shape: f32[1,512], index: 6, kind: input, shape index: {}]   ;;  %s4098_s7 = inlined_call_operand.vmem [shape: bf16[128,128], index: 7, kind: input, shape index: {}]   ;;  %s4099_s8 = inlined_call_operand.vmem [shape: bf16[128,512], index: 8, kind: input, shape index: {}]   ;;  %s4100_s9 = inlined_call_operand.vmem [shape: bf16[128,512], index: 9, kind: input, shape index: {}]   ;;  %s4101_s10 = inlined_call_operand.vmem [shape: f32[1,512], index: 10, kind: input, shape index: {}]   ;;  %s4102_s11 = inlined_call_operand.vmem [shape: f32[1,128], index: 11, kind: input, shape index: {}]   ;;  %s4103_s12 = inlined_call_operand.vmem [shape: f32[1,128], index: 12, kind: input, shape index: {}]   ;;  %s4104_s13 = inlined_call_operand.vmem [shape: f32[1,128], index: 13, kind: input, shape index: {}]   ;;  %s4105_s14 = inlined_call_operand.vmem [shape: f32[1,128], index: 14, kind: input, shape index: {}]   ;;  %s4106_s15 = inlined_call_operand.vmem [shape: f32[1,128], index: 15, kind: input, shape index: {}]   ;;  %s4107_s16 = inlined_call_operand.vmem [shape: f32[1,128], index: 16, kind: input, shape index: {}]   ;;  %s4108_s17 = inlined_call_operand.vmem [shape: bf16[128,128], index: 17, kind: input, shape index: {}]   ;;  %s4109_s18 = inlined_call_operand.vmem [shape: f32[1,128], index: 18, kind: input, shape index: {}]   ;;  %s4110_s19 = inlined_call_operand.vmem [shape: bf16[128,128], index: 19, kind: input, shape index: {}]   ;;  %s4111_s20 = inlined_call_operand.vmem [shape: f32[1,128], index: 20, kind: input, shape index: {}]   ;;  %s4112_s21 = inlined_call_operand.vmem [shape: f32[4,16,128], index: 21, kind: output, shape index: {}]  }
   0x1   :  { %4120 = sst [smem:[#allocation3_spill]] %s4091_s0 }
   0x2   :  { %4121 = sst [smem:[#allocation4_spill]] %s4092_s1 }
   0x3   :  { %4122 = sst [smem:[#allocation5_spill]] %s4093_s2  ;;  %s3425_s2 = smov 0  }
   0x4   :  { %4123 = sst [smem:[#allocation6_spill]] %s4094_s3 }
   0x5   :  { %4124 = sst [smem:[#allocation7_spill]] %s4095_s4 }
   0x6   :  { %4125 = sst [smem:[#allocation8_spill]] %s4096_s5 }
   0x7 LB: > { %4126 = sst [smem:[#allocation2_spill]] %s3310_s2  ;;  %s2678_s25 = sadd.s32 4294967295, %s3310_s2   ;;  %s3310_s2 = sphi %s3425_s2, %s31_s2  }
   0x8   : > { %p2682_p0 = scmp.ge.s32.totalorder %s3310_s2, 1  ;;  %p597_p1 = scmp.lt.s32.totalorder %s3310_s2, 5 }
   0xa   : > { %p598_p2 = pnand %p2682_p0, %p597_p1 }
   0xb   : > { %s4127_s3 = sld [smem:[#allocation6_spill]] (!%p598_p2)  ;;  %v3312_v1 = vmov (!%p598_p2), 0.0   ;;  %vm3313_vm0 = vmmov (!%p598_p2), 0   ;;  %p662_p3 = scmp.lt.s32.totalorder (!%p598_p2), %s2678_s25, 3  ;;  %v3314_v28 = vmov (!%p598_p2), 0   ;;  %vm796_vm1 = vcmask (!%p598_p2), 130048  }
   0xc   : > { %601 = sbr.rel (%p598_p2) target bundleno = 2001 (0x7d1), region = 104  ;;  %2913 = vmatprep.subr.bf16.mxu0 (!%p598_p2), %v3312_v1  ;;  %2933 = vmatprep.subr.bf16.mxu1 (!%p598_p2), %v3312_v1  ;;  %s4128_s4 = sld [smem:[#allocation3_spill]] (!%p598_p2) }
   0xd   : > { %2929 = vmatprep.mubr.msk.bf16.mxu0 (!%p598_p2), %vm3313_vm0, %v3312_v1  ;;  %2935 = vmatprep.mubr.msk.bf16.mxu1 (!%p598_p2), %vm3313_vm0, %v3312_v1  ;;  %s4129_s27 = sld [smem:[#allocation4_spill]] (!%p598_p2)  ;;  %s4131_s24 = sld [smem:[#allocation7_spill]] (!%p598_p2) }
   0xe   : > { %3032 = vset.pattern.permute.xlu0 (!%p598_p2), %v3314_v28 }
  0x11   : > { %v3033_v0 = vld [vmem:[%s4127_s3] sm:$0xff] (!%p598_p2)   ;;  %v3034_v2 = vld [vmem:[%s4127_s3 + $0x8] sm:$0xff] (!%p598_p2)   ;;  %v3035_v3 = vld [vmem:[%s4127_s3 + $0x10] sm:$0xff] (!%p598_p2)  }
  0x12   : > { %2914 = vmatpush3.bf16.msra.mxu0 (!%p598_p2), %v3033_v0  ;;  %v3036_v4 = vld [vmem:[%s4127_s3 + $0x18] sm:$0xff] (!%p598_p2)   ;;  %v3037_v5 = vld [vmem:[%s4127_s3 + $0x20] sm:$0xff] (!%p598_p2)   ;;  %v3038_v6 = vld [vmem:[%s4127_s3 + $0x28] sm:$0xff] (!%p598_p2)  }
  0x13   : > { %2915 = vmatprep.subr.bf16.mxu0 %v3312_v1  ;;  %s4136_s25 = smov (!%p662_p3, %s2678_s25), 3  ;;  %v3039_v7 = vld [vmem:[%s4127_s3 + $0x30] sm:$0xff]   ;;  %v3040_v8 = vld [vmem:[%s4127_s3 + $0x38] sm:$0xff]  }
  0x14   : > { %s4117_s26 = sshll.u32 %s4136_s25, 4  ;;  %s2871_s23 = sshll.u32 %s4136_s25, 3  ;;  %v3095_v29 = vld [vmem:[%s4131_s24 + $0xc] ss:$16 sps:$4 sm:$0xff]   ;;  %v3093_v30 = vld [vmem:[%s4131_s24 + $0x8] ss:$16 sps:$4 sm:$0xff]  }
  0x15   : > { %s666_s30 = scalar_lea.vmem %s4128_s4, %s4117_s26  ;;  %s3491_s28 = scalar_lea.vmem %s4129_s27, %s2871_s23  ;;  %v3101_v31 = vld [vmem:[%s4131_s24 + $0x2c] ss:$16 sps:$4 sm:$0xff]   ;;  %v3099_v32 = vld [vmem:[%s4131_s24 + $0x28] ss:$16 sps:$4 sm:$0xff]  }
  0x16   : > { %2916 = vmatpush3.bf16.msra.mxu0 %v3034_v2  ;;  %v3477_v9 = vld [vmem:[%s666_s30] sm:$0xff]  ;;  %v3479_v10 = vld [vmem:[%s666_s30 + $0x8] sm:$0xff]  ;;  %s4130_s4 = sld [smem:[#allocation8_spill]]  ;;  %s4132_s26 = sld [smem:[#allocation5_spill]] }
  0x17   : > { %2917 = vmatprep.subr.bf16.mxu0 %v3312_v1  ;;  %v3484_v11 = vpack.c.bf16 %v3479_v10, %v3477_v9  ;;  %v3107_v33 = vld [vmem:[%s4131_s24 + $0x4c] ss:$16 sps:$4 sm:$0xff]   ;;  %v3105_v34 = vld [vmem:[%s4131_s24 + $0x48] ss:$16 sps:$4 sm:$0xff]   ;;  %v3591_v49 = vld [vmem:[%s3491_s28] sm:$0xff]   ;;  %s4133_s0 = sshll.u32 %s4136_s25, 4 }
  0x18   : > { %v3113_v35 = vld [vmem:[%s4131_s24 + $0x6c] ss:$16 sps:$4 sm:$0xff]   ;;  %v3111_v36 = vld [vmem:[%s4131_s24 + $0x68] ss:$16 sps:$4 sm:$0xff]   ;;  %v3092_v2 = vld [vmem:[%s4131_s24 + $0x4] ss:$16 sps:$4 sm:$0xff]   ;;  %s676_s3 = scalar_lea.vmem %s4112_s21, %s4133_s0 }
  0x19   : > { %v3119_v37 = vld [vmem:[%s4131_s24 + $0x8c] ss:$16 sps:$4 sm:$0xff]   ;;  %v3117_v38 = vld [vmem:[%s4131_s24 + $0x88] ss:$16 sps:$4 sm:$0xff]  }
  0x1a   : > { %2918 = vmatpush3.bf16.msra.mxu0 %v3035_v3  ;;  %v3125_v39 = vld [vmem:[%s4131_s24 + $0xac] ss:$16 sps:$4 sm:$0xff]   ;;  %v3123_v40 = vld [vmem:[%s4131_s24 + $0xa8] ss:$16 sps:$4 sm:$0xff]   ;;  %v3090_v3 = vld [vmem:[%s4131_s24] ss:$16 sps:$4 sm:$0xff]  }
  0x1b   : > { %2919 = vmatprep.subr.bf16.mxu0 %v3312_v1  ;;  %v3131_v41 = vld [vmem:[%s4131_s24 + $0xcc] ss:$16 sps:$4 sm:$0xff]   ;;  %v3129_v42 = vld [vmem:[%s4131_s24 + $0xc8] ss:$16 sps:$4 sm:$0xff]  }
  0x1c   : > { %v3045_v12 = vld [vmem:[%s4130_s4 + $0x8] ss:$16 sps:$4 sm:$0xff]   ;;  %v3047_v13 = vld [vmem:[%s4130_s4 + $0xc] ss:$16 sps:$4 sm:$0xff]   ;;  %v3044_v46 = vld [vmem:[%s4130_s4 + $0x4] ss:$16 sps:$4 sm:$0xff]  }
  0x1d   : > { %v3053_v14 = vld [vmem:[%s4130_s4 + $0x2c] ss:$16 sps:$4 sm:$0xff]   ;;  %v3051_v15 = vld [vmem:[%s4130_s4 + $0x28] ss:$16 sps:$4 sm:$0xff]   ;;  %v3042_v50 = vld [vmem:[%s4130_s4] ss:$16 sps:$4 sm:$0xff]  }
  0x1e   : > { %2920 = vmatpush3.bf16.msra.mxu0 %v3036_v4  ;;  %v3059_v16 = vld [vmem:[%s4130_s4 + $0x4c] ss:$16 sps:$4 sm:$0xff]   ;;  %v3057_v17 = vld [vmem:[%s4130_s4 + $0x48] ss:$16 sps:$4 sm:$0xff]   ;;  %v3050_v51 = vld [vmem:[%s4130_s4 + $0x24] ss:$16 sps:$4 sm:$0xff]  }
  0x1f   : > { %2921 = vmatprep.subr.bf16.mxu0 %v3312_v1  ;;  %v3065_v18 = vld [vmem:[%s4130_s4 + $0x6c] ss:$16 sps:$4 sm:$0xff]   ;;  %v3063_v19 = vld [vmem:[%s4130_s4 + $0x68] ss:$16 sps:$4 sm:$0xff]   ;;  %v3048_v52 = vld [vmem:[%s4130_s4 + $0x20] ss:$16 sps:$4 sm:$0xff]  }
  0x20   : > { %v3071_v20 = vld [vmem:[%s4130_s4 + $0x8c] ss:$16 sps:$4 sm:$0xff]   ;;  %v3069_v21 = vld [vmem:[%s4130_s4 + $0x88] ss:$16 sps:$4 sm:$0xff]   ;;  %v3056_v53 = vld [vmem:[%s4130_s4 + $0x44] ss:$16 sps:$4 sm:$0xff]  }
  0x21   : > { %v3077_v22 = vld [vmem:[%s4130_s4 + $0xac] ss:$16 sps:$4 sm:$0xff]   ;;  %v3075_v23 = vld [vmem:[%s4130_s4 + $0xa8] ss:$16 sps:$4 sm:$0xff]   ;;  %v3054_v54 = vld [vmem:[%s4130_s4 + $0x40] ss:$16 sps:$4 sm:$0xff]  }
  0x22   : > { %2922 = vmatpush3.bf16.msra.mxu0 %v3037_v5  ;;  %v3083_v24 = vld [vmem:[%s4130_s4 + $0xcc] ss:$16 sps:$4 sm:$0xff]   ;;  %v3081_v25 = vld [vmem:[%s4130_s4 + $0xc8] ss:$16 sps:$4 sm:$0xff]   ;;  %v3062_v55 = vld [vmem:[%s4130_s4 + $0x64] ss:$16 sps:$4 sm:$0xff]  }
  0x23   : > { %2923 = vmatprep.subr.bf16.mxu0 %v3312_v1  ;;  %v3089_v26 = vld [vmem:[%s4130_s4 + $0xec] ss:$16 sps:$4 sm:$0xff]   ;;  %v3087_v27 = vld [vmem:[%s4130_s4 + $0xe8] ss:$16 sps:$4 sm:$0xff]   ;;  %v3060_v56 = vld [vmem:[%s4130_s4 + $0x60] ss:$16 sps:$4 sm:$0xff]  }
  0x24   : > { %v3068_v57 = vld [vmem:[%s4130_s4 + $0x84] ss:$16 sps:$4 sm:$0xff]   ;;  %v3066_v58 = vld [vmem:[%s4130_s4 + $0x80] ss:$16 sps:$4 sm:$0xff]  }
  0x25   : > { %v3074_v59 = vld [vmem:[%s4130_s4 + $0xa4] ss:$16 sps:$4 sm:$0xff]   ;;  %v3072_v60 = vld [vmem:[%s4130_s4 + $0xa0] ss:$16 sps:$4 sm:$0xff]  }
  0x26   : > { %2924 = vmatpush3.bf16.msra.mxu0 %v3038_v6  ;;  %v3080_v61 = vld [vmem:[%s4130_s4 + $0xc4] ss:$16 sps:$4 sm:$0xff]   ;;  %v3078_v62 = vld [vmem:[%s4130_s4 + $0xc0] ss:$16 sps:$4 sm:$0xff]  }
  0x27   : > { %2925 = vmatprep.subr.bf16.mxu0 %v3312_v1  ;;  %v3086_v63 = vld [vmem:[%s4130_s4 + $0xe4] ss:$16 sps:$4 sm:$0xff]   ;;  %v3084_v0 = vld [vmem:[%s4130_s4 + $0xe0] ss:$16 sps:$4 sm:$0xff]  }
  0x28   : > { %v3098_v4 = vld [vmem:[%s4131_s24 + $0x24] ss:$16 sps:$4 sm:$0xff]   ;;  %v3096_v5 = vld [vmem:[%s4131_s24 + $0x20] ss:$16 sps:$4 sm:$0xff]  }
  0x29   : > { %v3104_v6 = vld [vmem:[%s4131_s24 + $0x44] ss:$16 sps:$4 sm:$0xff]  }
  0x2a   : > { %2926 = vmatpush3.bf16.msra.mxu0 %v3039_v7  ;;  %v3102_v7 = vld [vmem:[%s4131_s24 + $0x40] ss:$16 sps:$4 sm:$0xff]  }
  0x2b   : > { %2927 = vmatprep.subr.bf16.mxu0 %v3312_v1 }
  0x2e   : > { %2928 = vmatpush3.bf16.msra.mxu0 %v3040_v8  ;;  %v3110_v8 = vld [vmem:[%s4131_s24 + $0x64] ss:$16 sps:$4 sm:$0xff]  }
  0x2f   : > { %1109 = vmatprep.subr.bf16.mxu0 %v3047_v13  ;;  %v3114_v13 = vld [vmem:[%s4131_s24 + $0x80] ss:$16 sps:$4 sm:$0xff]  }
  0x31   : > { %2930 = vmatmul.mubr.bf16.vlgmr.msra.gmra.mrb[0].mxu0 %v3484_v11 }
  0x32   : > { %1110 = vmatpush1.bf16.msra.mxu0 %v3045_v12  ;;  %1141 = vmatprep.mubr.bf16.mxu0 %v3314_v28  ;;  %v3116_v12 = vld [vmem:[%s4131_s24 + $0x84] ss:$16 sps:$4 sm:$0xff]  }
  0x33   : > { %1111 = vmatprep.subr.bf16.mxu0 %v3053_v14  ;;  %v3122_v14 = vld [vmem:[%s4131_s24 + $0xa4] ss:$16 sps:$4 sm:$0xff]  }
  0x36   : > { %1112 = vmatpush1.bf16.msra.mxu0 %v3051_v15  ;;  %v3120_v15 = vld [vmem:[%s4131_s24 + $0xa0] ss:$16 sps:$4 sm:$0xff]  }
  0x37   : > { %1113 = vmatprep.subr.bf16.mxu0 %v3059_v16  ;;  %v3128_v16 = vld [vmem:[%s4131_s24 + $0xc4] ss:$16 sps:$4 sm:$0xff]  }
  0x3a   : > { %1114 = vmatpush1.bf16.msra.mxu0 %v3057_v17  ;;  %v3126_v17 = vld [vmem:[%s4131_s24 + $0xc0] ss:$16 sps:$4 sm:$0xff]  }
  0x3b   : > { %1115 = vmatprep.subr.bf16.mxu0 %v3065_v18  ;;  %v3134_v18 = vld [vmem:[%s4131_s24 + $0xe4] ss:$16 sps:$4 sm:$0xff]  }
  0x3e   : > { %1116 = vmatpush1.bf16.msra.mxu0 %v3063_v19  ;;  %v3137_v19 = vld [vmem:[%s4131_s24 + $0xec] ss:$16 sps:$4 sm:$0xff]  }
  0x3f   : > { %1117 = vmatprep.subr.bf16.mxu0 %v3071_v20  ;;  %v3132_v20 = vld [vmem:[%s4131_s24 + $0xe0] ss:$16 sps:$4 sm:$0xff]  }
  0x42   : > { %1118 = vmatpush1.bf16.msra.mxu0 %v3069_v21  ;;  %v3135_v21 = vld [vmem:[%s4131_s24 + $0xe8] ss:$16 sps:$4 sm:$0xff]  }
  0x43   : > { %1119 = vmatprep.subr.bf16.mxu0 %v3077_v22  ;;  %v680_v22 = vld [vmem:[%s4132_s26] sm:$0xff] }
  0x44   : > { %1470 = vperm.xlu0 %3032, %v680_v22  }
  0x46   : > { %1120 = vmatpush1.bf16.msra.mxu0 %v3075_v23  ;;  %v681_v23 = vld [vmem:[%s4132_s26 + $0x8] sm:$0xff] }
  0x47   : > { %1121 = vmatprep.subr.bf16.mxu0 %v3083_v24 }
  0x48   : > { %1475 = vperm.xlu0 %3032, %v681_v23  }
  0x4a   : > { %1122 = vmatpush1.bf16.msra.mxu0 %v3081_v25 }
  0x4b   : > { %1123 = vmatprep.subr.bf16.mxu0 %v3089_v26 }
  0x4e   : > { %1124 = vmatpush1.bf16.msra.mxu0 %v3087_v27 }
  0x4f   : > { %1355 = vmatprep.subr.bf16.mxu0 %v3095_v29 }
  0x51   : > { %1142 = vmatmul.mubr.bf16.vlgmr.msra.gmra.mrb[4].mxu0 %v3484_v11 }
  0x52   : > { %1356 = vmatpush1.bf16.msra.mxu0 %v3093_v30  ;;  %1387 = vmatprep.mubr.bf16.mxu0 %v3314_v28  ;;  %v3138_v30 = vld [vmem:[%s4098_s7] sm:$0xff]  }
  0x53   : > { %1357 = vmatprep.subr.bf16.mxu0 %v3101_v31  ;;  %v3139_v31 = vld [vmem:[%s4098_s7 + $0x8] sm:$0xff]  }
  0x56   : > { %1358 = vmatpush1.bf16.msra.mxu0 %v3099_v32  ;;  %v3140_v32 = vld [vmem:[%s4098_s7 + $0x10] sm:$0xff]  }
  0x57   : > { %1359 = vmatprep.subr.bf16.mxu0 %v3107_v33  ;;  %v3141_v33 = vld [vmem:[%s4098_s7 + $0x18] sm:$0xff]  }
  0x5a   : > { %1360 = vmatpush1.bf16.msra.mxu0 %v3105_v34  ;;  %v3142_v34 = vld [vmem:[%s4098_s7 + $0x20] sm:$0xff]  }
  0x5b   : > { %1361 = vmatprep.subr.bf16.mxu0 %v3113_v35  ;;  %v3143_v35 = vld [vmem:[%s4098_s7 + $0x28] sm:$0xff]  }
  0x5e   : > { %1362 = vmatpush1.bf16.msra.mxu0 %v3111_v36  ;;  %v3144_v36 = vld [vmem:[%s4098_s7 + $0x30] sm:$0xff]  }
  0x5f   : > { %1363 = vmatprep.subr.bf16.mxu0 %v3119_v37  ;;  %v3145_v37 = vld [vmem:[%s4098_s7 + $0x38] sm:$0xff]  }
  0x62   : > { %1364 = vmatpush1.bf16.msra.mxu0 %v3117_v38  ;;  %v3148_v38 = vld [vmem:[%s4100_s9 + $0x4] ss:$16 sps:$4 sm:$0xff]  }
  0x63   : > { %1365 = vmatprep.subr.bf16.mxu0 %v3125_v39  ;;  %v1400_v39 = vlaneseq }
  0x66   : > { %1366 = vmatpush1.bf16.msra.mxu0 %v3123_v40  ;;  %v3743_v40 = vshrl.u32 %v1400_v39, 7 }
  0x67   : > { %1367 = vmatprep.subr.bf16.mxu0 %v3131_v41 }
  0x68   : > { %v1402_v41 = vsub.s32 0, %v3743_v40 }
  0x6a   : > { %1368 = vmatpush1.bf16.msra.mxu0 %v3129_v42  ;;  %v1398_v42 = vld [vmem:[%s4097_s6] sm:$0xf] }
  0x6b   : > { %1369 = vmatprep.subr.bf16.mxu0 %v3137_v19 }
  0x6e   : > { %1370 = vmatpush1.bf16.msra.mxu0 %v3135_v21 }
  0x6f   : > { %2959 = vmatprep.subr.bf16.mxu0 %v3312_v1 }
 0x104   : > { %v783_v43 = vpop.f32.mrb[0].mxu0 }
 0x105   : > { %v2931_v44 = vpop.f32.mrb[1].mxu0 }
 0x106   : > { %v786_v45 = vpop.f32.mrb[2].mxu0 }
 0x107   : > { %v790_v47 = vpack.c.bf16 %v786_v45, %v783_v43  ;;  %v2932_v48 = vpop.f32.mrb[3].mxu0  ;;  %v1403_v43 = vrot.slane %v1398_v42, %v1402_v41 }
 0x108   : > { %v1406_v48 = vsub.s32 1, %v3743_v40 }
 0x109   : > { %2934 = vmatpush3.bf16.msra.mxu1 %v790_v47 }
 0x10a   : > { %1066 = vmatprep.subr.bf16.mxu1 %v3044_v46 }
 0x10c   : > { %2936 = vmatmul.mubr.msk.bf16.vlgmr.msra.gmra.mrb[0].mxu1 %vm796_vm1, %v3591_v49 }
 0x10d   : > { %1067 = vmatpush1.bf16.msra.mxu1 %v3042_v50  ;;  %1098 = vmatprep.mubr.bf16.mxu1 %v3314_v28 }
 0x10e   : > { %1068 = vmatprep.subr.bf16.mxu1 %v3050_v51 }
 0x111   : > { %1069 = vmatpush1.bf16.msra.mxu1 %v3048_v52 }
 0x112   : > { %1070 = vmatprep.subr.bf16.mxu1 %v3056_v53 }
 0x115   : > { %1071 = vmatpush1.bf16.msra.mxu1 %v3054_v54 }
 0x116   : > { %1072 = vmatprep.subr.bf16.mxu1 %v3062_v55 }
 0x119   : > { %1073 = vmatpush1.bf16.msra.mxu1 %v3060_v56 }
 0x11a   : > { %1074 = vmatprep.subr.bf16.mxu1 %v3068_v57  ;;  %v1407_v57 = vrot.slane %v1398_v42, %v1406_v48 }
 0x11d   : > { %1075 = vmatpush1.bf16.msra.mxu1 %v3066_v58 }
 0x11e   : > { %1076 = vmatprep.subr.bf16.mxu1 %v3074_v59 }
 0x121   : > { %1077 = vmatpush1.bf16.msra.mxu1 %v3072_v60 }
 0x122   : > { %1078 = vmatprep.subr.bf16.mxu1 %v3080_v61 }
 0x125   : > { %1079 = vmatpush1.bf16.msra.mxu1 %v3078_v62 }
 0x126   : > { %1080 = vmatprep.subr.bf16.mxu1 %v3086_v63 }
 0x129   : > { %1081 = vmatpush1.bf16.msra.mxu1 %v3084_v0 }
 0x12a   : > { %1312 = vmatprep.subr.bf16.mxu1 %v3092_v2 }
 0x12c   : > { %1099 = vmatmul.mubr.bf16.vlgmr.msra.gmra.mrb[4].mxu1 %v3484_v11  ;;  %v3108_v11 = vld [vmem:[%s4131_s24 + $0x60] ss:$16 sps:$4 sm:$0xff]  }
 0x12d   : > { %1313 = vmatpush1.bf16.msra.mxu1 %v3090_v3  ;;  %1344 = vmatprep.mubr.bf16.mxu1 %v3314_v28 }
 0x12e   : > { %1314 = vmatprep.subr.bf16.mxu1 %v3098_v4  ;;  %v1414_v4 = vsub.s32 3, %v3743_v40 }
 0x131   : > { %1315 = vmatpush1.bf16.msra.mxu1 %v3096_v5  ;;  %v1410_v5 = vsub.s32 2, %v3743_v40 }
 0x132   : > { %1316 = vmatprep.subr.bf16.mxu1 %v3104_v6  ;;  %v1415_v6 = vrot.slane %v1398_v42, %v1414_v4 }
 0x135   : > { %1317 = vmatpush1.bf16.msra.mxu1 %v3102_v7  ;;  %v1411_v7 = vrot.slane %v1398_v42, %v1410_v5 }
 0x136   : > { %1318 = vmatprep.subr.bf16.mxu1 %v3110_v8 }
 0x139   : > { %1319 = vmatpush1.bf16.msra.mxu1 %v3108_v11 }
 0x13a   : > { %1320 = vmatprep.subr.bf16.mxu1 %v3116_v12 }
 0x13d   : > { %1321 = vmatpush1.bf16.msra.mxu1 %v3114_v13 }
 0x13e   : > { %1322 = vmatprep.subr.bf16.mxu1 %v3122_v14 }
 0x141   : > { %1323 = vmatpush1.bf16.msra.mxu1 %v3120_v15 }
 0x142   : > { %1324 = vmatprep.subr.bf16.mxu1 %v3128_v16 }
 0x145   : > { %1325 = vmatpush1.bf16.msra.mxu1 %v3126_v17 }
 0x146   : > { %1326 = vmatprep.subr.bf16.mxu1 %v3134_v18 }
 0x149   : > { %1327 = vmatpush1.bf16.msra.mxu1 %v3132_v20 }
 0x14a   : > { %2939 = vmatprep.subr.bf16.mxu1 %v3312_v1 }
 0x1df   : > { %v834_v24 = vpop.f32.mrb[0].mxu1 }
 0x1e0   : > { %v2937_v25 = vpop.f32.mrb[1].mxu1 }
 0x1e1   : > { %v837_v26 = vpop.f32.mrb[2].mxu1 }
 0x1e2   : > { %v841_v27 = vpack.c.bf16 %v837_v26, %v834_v24  ;;  %v2938_v29 = vpop.f32.mrb[3].mxu1 }
 0x1e4   : > { %1345 = vmatmul.mubr.bf16.vlgmr.msra.gmra.mrb[4].mxu1 %v841_v27  ;;  %1388 = vmatmul.mubr.bf16.vlgmr.msra.gmra.mrb[4].mxu0 %v841_v27 }
 0x1e5   : > { %2955 = vmatprep.mubr.msk.bf16.mxu1 %vm3313_vm0, %v3312_v1  ;;  %2961 = vmatprep.mubr.msk.bf16.mxu0 %vm3313_vm0, %v3312_v1 }
 0x1e6   : > { %2940 = vmatpush3.bf16.msra.mxu1 %v3138_v30 }
 0x1e7   : > { %2941 = vmatprep.subr.bf16.mxu1 %v3312_v1 }
 0x1ea   : > { %2942 = vmatpush3.bf16.msra.mxu1 %v3139_v31 }
 0x1eb   : > { %2943 = vmatprep.subr.bf16.mxu1 %v3312_v1 }
 0x1ee   : > { %2944 = vmatpush3.bf16.msra.mxu1 %v3140_v32  ;;  %v3762_v32 = vpop.permute.xlu0 %1470 }
 0x1ef   : > { %2945 = vmatprep.subr.bf16.mxu1 %v3312_v1 }
 0x1f2   : > { %2946 = vmatpush3.bf16.msra.mxu1 %v3141_v33  ;;  %v3765_v39 = vpop.permute.xlu0 %1475 }
 0x1f3   : > { %2947 = vmatprep.subr.bf16.mxu1 %v3312_v1 }
 0x1f6   : > { %2948 = vmatpush3.bf16.msra.mxu1 %v3142_v34 }
 0x1f7   : > { %2949 = vmatprep.subr.bf16.mxu1 %v3312_v1 }
 0x1fa   : > { %2950 = vmatpush3.bf16.msra.mxu1 %v3143_v35 }
 0x1fb   : > { %2951 = vmatprep.subr.bf16.mxu1 %v3312_v1 }
 0x1fe   : > { %2952 = vmatpush3.bf16.msra.mxu1 %v3144_v36 }
 0x1ff   : > { %2953 = vmatprep.subr.bf16.mxu1 %v3312_v1 }
 0x202   : > { %2954 = vmatpush3.bf16.msra.mxu1 %v3145_v37 }
 0x203   : > { %1893 = vmatprep.subr.bf16.mxu1 %v3148_v38 }
 0x2b7   : > { %v1346_v44 = vpop.f32.mrb[4].mxu1  ;;  %v1389_v45 = vpop.f32.mrb[4].mxu0 }
 0x2b8   : > { %v1420_v46 = vadd.f32 %v1403_v43, %v1346_v44  ;;  %v1348_v47 = vpop.f32.mrb[5].mxu1  ;;  %v1391_v50 = vpop.f32.mrb[5].mxu0  ;;  %v1422_v14 = vadd.f32 %v1411_v7, %v1389_v45 }
 0x2b9   : > { %v1350_v51 = vpop.f32.mrb[6].mxu1  ;;  %v1393_v52 = vpop.f32.mrb[6].mxu0  ;;  %v1421_v59 = vadd.f32 %v1407_v57, %v1348_v47  ;;  %v1423_v11 = vadd.f32 %v1415_v6, %v1391_v50 }
 0x2ba   : > { %v2763_v53 = vmul.f32 -1.442695, %v1420_v46  ;;  %v1424_v54 = vadd.f32 %v1403_v43, %v1350_v51  ;;  %v1352_v55 = vpop.f32.mrb[7].mxu1  ;;  %v1395_v56 = vpop.f32.mrb[7].mxu0  ;;  %v1426_v20 = vadd.f32 %v1411_v7, %v1393_v52  ;;  %v2768_v7 = vld [vmem:[%s4103_s12] ss:$0 sm:$0xff] }
 0x2bb   : > { %v1425_v60 = vadd.f32 %v1407_v57, %v1352_v55  ;;  %v2765_v61 = vmul.f32 -1.442695, %v1421_v59  ;;  %v1427_v16 = vadd.f32 %v1415_v6, %v1395_v56 }
 0x2bc   : > { %3258 = vpow2.f32 %v2763_v53  ;;  %v2764_v58 = vmul.f32 -1.442695, %v1424_v54 }
 0x2bd   : > { %v2766_v63 = vmul.f32 -1.442695, %v1425_v60 }
 0x2be   : > { %3260 = vpow2.f32 %v2764_v58 }
 0x2bf   : > { %3262 = vpow2.f32 %v2765_v61 }
 0x2c6   : > { %v3259_v62 = vpop.eup %3258 }
 0x2c7   : > { %v1434_v0 = vadd.f32 1.0, %v3259_v62 }
 0x2c8   : > { %v3261_v2 = vpop.eup %3260 }
 0x2c9   : > { %3264 = vrcp.f32 %v1434_v0  ;;  %v1435_v3 = vadd.f32 1.0, %v3261_v2  ;;  %v3263_v8 = vpop.eup %3262  ;;  %v2767_v0 = vld [vmem:[%s4102_s11] ss:$0 sm:$0xff] }
 0x2ca   : > { %3266 = vpow2.f32 %v2766_v63  ;;  %v1446_v18 = vadd.f32 1.0, %v3263_v8 }
 0x2cb   : > { %3268 = vrcp.f32 %v1435_v3 }
 0x2d3   : > { %v3265_v12 = vpop.eup %3264 }
 0x2d4   : > { %v3267_v13 = vpop.eup %3266  ;;  %v1452_v15 = vmul.f32 %v3265_v12, %v1423_v11 }
 0x2d5   : > { %v3269_v17 = vpop.eup %3268  ;;  %v1447_v22 = vadd.f32 1.0, %v3267_v13 }
 0x2d6   : > { %v1454_v19 = vadd.f32 %v1452_v15, %v1422_v14  ;;  %v1453_v21 = vmul.f32 %v3269_v17, %v1427_v16  ;;  %v3146_v14 = vld [vmem:[%s4100_s9] ss:$16 sps:$4 sm:$0xff]   ;;  %v3151_v16 = vld [vmem:[%s4100_s9 + $0x24] ss:$16 sps:$4 sm:$0xff]  }
 0x2d7   : > { %v3149_v17 = vld [vmem:[%s4100_s9 + $0x20] ss:$16 sps:$4 sm:$0xff]  }
 0x2d8   : > { %3270 = vtanh.f32 %v1454_v19  ;;  %v1455_v23 = vadd.f32 %v1453_v21, %v1426_v20  ;;  %v3152_v19 = vld [vmem:[%s4100_s9 + $0x40] ss:$16 sps:$4 sm:$0xff]   ;;  %v3157_v20 = vld [vmem:[%s4100_s9 + $0x64] ss:$16 sps:$4 sm:$0xff]  }
 0x2d9   : > { %3272 = vrcp.f32 %v1446_v18  ;;  %v3154_v18 = vld [vmem:[%s4100_s9 + $0x44] ss:$16 sps:$4 sm:$0xff]   ;;  %v3155_v21 = vld [vmem:[%s4100_s9 + $0x60] ss:$16 sps:$4 sm:$0xff]  }
 0x2da   : > { %3274 = vtanh.f32 %v1455_v23  ;;  %v3158_v23 = vld [vmem:[%s4100_s9 + $0x80] ss:$16 sps:$4 sm:$0xff]  }
 0x2db   : > { %3276 = vrcp.f32 %v1447_v22  ;;  %v3160_v22 = vld [vmem:[%s4100_s9 + $0x84] ss:$16 sps:$4 sm:$0xff]  }
 0x2e2   : > { %v3271_v24 = vpop.eup %3270 }
 0x2e3   : > { %v3273_v25 = vpop.eup %3272  ;;  %v1458_v26 = vsub.f32 %v3477_v9, %v3271_v24 }
 0x2e4   : > { %v3275_v27 = vpop.eup %3274 }
 0x2e5   : > { %v1460_v29 = vmul.f32 %v3273_v25, %v1458_v26  ;;  %v1459_v30 = vsub.f32 %v3479_v10, %v3275_v27  ;;  %v3277_v31 = vpop.eup %3276  ;;  %v3161_v25 = vld [vmem:[%s4100_s9 + $0xa0] ss:$16 sps:$4 sm:$0xff]   ;;  %v3166_v26 = vld [vmem:[%s4100_s9 + $0xc4] ss:$16 sps:$4 sm:$0xff]  }
 0x2e7   : > { %v1462_v33 = vadd.f32 %v3271_v24, %v1460_v29  ;;  %v1461_v34 = vmul.f32 %v3277_v31, %v1459_v30  ;;  %v3163_v24 = vld [vmem:[%s4100_s9 + $0xa4] ss:$16 sps:$4 sm:$0xff]   ;;  %v3167_v30 = vld [vmem:[%s4100_s9 + $0xe0] ss:$16 sps:$4 sm:$0xff]  }
 0x2e8   : > { %v3169_v29 = vld [vmem:[%s4100_s9 + $0xe4] ss:$16 sps:$4 sm:$0xff]   ;;  %v3194_v31 = vld [vmem:[%s4099_s8] ss:$16 sps:$4 sm:$0xff]  }
 0x2e9   : > { %v1466_v35 = vmax.f32 %v1462_v33, 0.0  ;;  %v1463_v36 = vadd.f32 %v3275_v27, %v1461_v34  ;;  %v3164_v27 = vld [vmem:[%s4100_s9 + $0xc0] ss:$16 sps:$4 sm:$0xff]   ;;  %v3196_v33 = vld [vmem:[%s4099_s8 + $0x4] ss:$16 sps:$4 sm:$0xff]  }
 0x2ea   : > { %v3202_v34 = vld [vmem:[%s4099_s8 + $0x24] ss:$16 sps:$4 sm:$0xff]  }
 0x2eb   : > { %v1478_v37 = vmul.f32 %v3762_v32, %v1466_v35  ;;  %v1467_v38 = vmax.f32 %v1463_v36, 0.0  ;;  %v3208_v36 = vld [vmem:[%s4099_s8 + $0x44] ss:$16 sps:$4 sm:$0xff]  }
 0x2ed   : > { %v1479_v42 = vmul.f32 %v3765_v39, %v1467_v38  ;;  %v1487_v43 = vmul.f32 %v1478_v37, %v1466_v35 }
 0x2ef   : > { %v1480_v9 = vadd.f32 %v1479_v42, %v1478_v37  ;;  %v1488_v44 = vmul.f32 %v1479_v42, %v1467_v38  ;;  %v3206_v37 = vld [vmem:[%s4099_s8 + $0x40] ss:$16 sps:$4 sm:$0xff]  }
 0x2f0   : > { %v3212_v42 = vld [vmem:[%s4099_s8 + $0x60] ss:$16 sps:$4 sm:$0xff]  }
 0x2f1   : > { %v1481_v45 = vrot.slane %v1480_v9, 4  ;;  %v1489_v46 = vadd.f32 %v1488_v44, %v1487_v43  ;;  %v3220_v43 = vld [vmem:[%s4099_s8 + $0x84] ss:$16 sps:$4 sm:$0xff]  }
 0x2f2   : > { %v3226_v44 = vld [vmem:[%s4099_s8 + $0xa4] ss:$16 sps:$4 sm:$0xff]  }
 0x2f3   : > { %v1482_v10 = vadd.f32 %v1481_v45, %v1480_v9  ;;  %v1490_v47 = vrot.slane %v1489_v46, 4  ;;  %v3218_v9 = vld [vmem:[%s4099_s8 + $0x80] ss:$16 sps:$4 sm:$0xff]  }
 0x2f4   : > { %v3224_v45 = vld [vmem:[%s4099_s8 + $0xa0] ss:$16 sps:$4 sm:$0xff]  }
 0x2f5   : > { %v1483_v50 = vrot.slane %v1482_v10, 2  ;;  %v1491_v51 = vadd.f32 %v1490_v47, %v1489_v46  ;;  %v3232_v46 = vld [vmem:[%s4099_s8 + $0xc4] ss:$16 sps:$4 sm:$0xff]  }
 0x2f7   : > { %v1484_v52 = vadd.f32 %v1483_v50, %v1482_v10  ;;  %v1492_v53 = vrot.slane %v1491_v51, 2  ;;  %v3230_v10 = vld [vmem:[%s4099_s8 + $0xc0] ss:$16 sps:$4 sm:$0xff]  }
 0x2f9   : > { %v1485_v54 = vrot.slane %v1484_v52, 1  ;;  %v1493_v55 = vadd.f32 %v1492_v53, %v1491_v51 }
 0x2fb   : > { %v1486_v56 = vadd.f32 %v1485_v54, %v1484_v52  ;;  %v1494_v57 = vrot.slane %v1493_v55, 1  ;;  %v3172_v52 = vld [vmem:[%s4100_s9 + $0xc] ss:$16 sps:$4 sm:$0xff]  }
 0x2fd   : > { %v1495_v58 = vadd.f32 %v1494_v57, %v1493_v55  ;;  %v1496_v59 = vmul.f32 %v1486_v56, %v1486_v56  ;;  %v1500_v60 = vsub.f32 %v1466_v35, %v1486_v56  ;;  %v1501_v61 = vsub.f32 %v1467_v38, %v1486_v56  ;;  %v3200_v35 = vld [vmem:[%s4099_s8 + $0x20] ss:$16 sps:$4 sm:$0xff]   ;;  %v3214_v38 = vld [vmem:[%s4099_s8 + $0x64] ss:$16 sps:$4 sm:$0xff]   ;;  %v3170_v55 = vld [vmem:[%s4100_s9 + $0x8] ss:$16 sps:$4 sm:$0xff]  }
 0x2fe   : > { %v3175_v56 = vld [vmem:[%s4100_s9 + $0x2c] ss:$16 sps:$4 sm:$0xff]   ;;  %v3173_v57 = vld [vmem:[%s4100_s9 + $0x28] ss:$16 sps:$4 sm:$0xff]  }
 0x2ff   : > { %v1497_v62 = vsub.f32 %v1495_v58, %v1496_v59  ;;  %v1509_v2 = vmul.f32 %v2767_v0, %v1501_v61  ;;  %v1508_v3 = vmul.f32 %v2767_v0, %v1500_v60  ;;  %v3178_v58 = vld [vmem:[%s4100_s9 + $0x4c] ss:$16 sps:$4 sm:$0xff]   ;;  %v3176_v59 = vld [vmem:[%s4100_s9 + $0x48] ss:$16 sps:$4 sm:$0xff]  }
 0x300   : > { %v3179_v60 = vld [vmem:[%s4100_s9 + $0x68] ss:$16 sps:$4 sm:$0xff]   ;;  %v3184_v61 = vld [vmem:[%s4100_s9 + $0x8c] ss:$16 sps:$4 sm:$0xff]  }
 0x301   : > { %v1498_v63 = vadd.f32 1e-05, %v1497_v62  ;;  %v3182_v62 = vld [vmem:[%s4100_s9 + $0x88] ss:$16 sps:$4 sm:$0xff]  }
 0x302   : > { %v3185_v0 = vld [vmem:[%s4100_s9 + $0xa8] ss:$16 sps:$4 sm:$0xff]  }
 0x303   : > { %3278 = vrsqrt.f32 %v1498_v63  ;;  %v3187_v63 = vld [vmem:[%s4100_s9 + $0xac] ss:$16 sps:$4 sm:$0xff]  }
 0x30d   : > { %v3279_v6 = vpop.eup %3278 }
 0x30e   : > { %v1510_v8 = vmul.f32 %v3279_v6, %v1508_v3  ;;  %v1511_v11 = vmul.f32 %v3279_v6, %v1509_v2  ;;  %v3190_v2 = vld [vmem:[%s4100_s9 + $0xcc] ss:$16 sps:$4 sm:$0xff]   ;;  %v3188_v3 = vld [vmem:[%s4100_s9 + $0xc8] ss:$16 sps:$4 sm:$0xff]  }
 0x30f   : > { %v3193_v6 = vld [vmem:[%s4100_s9 + $0xec] ss:$16 sps:$4 sm:$0xff]  }
 0x310   : > { %v3774_v12 = vadd.f32 %v2768_v7, %v1510_v8  ;;  %v3776_v13 = vadd.f32 %v2768_v7, %v1511_v11  ;;  %v3191_v7 = vld [vmem:[%s4100_s9 + $0xe8] ss:$16 sps:$4 sm:$0xff]   ;;  %v3199_v8 = vld [vmem:[%s4099_s8 + $0xc] ss:$16 sps:$4 sm:$0xff]  }
 0x311   : > { %v3197_v11 = vld [vmem:[%s4099_s8 + $0x8] ss:$16 sps:$4 sm:$0xff]  }
 0x312   : > { %v3783_v15 = vpack.c.bf16 %v3776_v13, %v3774_v12 }
 0x314   : > { %2956 = vmatmul.mubr.bf16.vlgmr.msra.gmra.mrb[8].mxu1 %v3783_v15 }
 0x315   : > { %1894 = vmatpush1.bf16.msra.mxu1 %v3146_v14  ;;  %1925 = vmatprep.mubr.bf16.mxu1 %v3314_v28  ;;  %v3205_v14 = vld [vmem:[%s4099_s8 + $0x2c] ss:$16 sps:$4 sm:$0xff]  }
 0x316   : > { %1895 = vmatprep.subr.bf16.mxu1 %v3151_v16  ;;  %v3203_v16 = vld [vmem:[%s4099_s8 + $0x28] ss:$16 sps:$4 sm:$0xff]  }
 0x319   : > { %1896 = vmatpush1.bf16.msra.mxu1 %v3149_v17  ;;  %v3211_v17 = vld [vmem:[%s4099_s8 + $0x4c] ss:$16 sps:$4 sm:$0xff]  }
 0x31a   : > { %1897 = vmatprep.subr.bf16.mxu1 %v3154_v18  ;;  %v3209_v18 = vld [vmem:[%s4099_s8 + $0x48] ss:$16 sps:$4 sm:$0xff]  }
 0x31d   : > { %1898 = vmatpush1.bf16.msra.mxu1 %v3152_v19  ;;  %v3223_v19 = vld [vmem:[%s4099_s8 + $0x8c] ss:$16 sps:$4 sm:$0xff]  }
 0x31e   : > { %1899 = vmatprep.subr.bf16.mxu1 %v3157_v20  ;;  %v3221_v20 = vld [vmem:[%s4099_s8 + $0x88] ss:$16 sps:$4 sm:$0xff]  }
 0x321   : > { %1900 = vmatpush1.bf16.msra.mxu1 %v3155_v21  ;;  %v3229_v21 = vld [vmem:[%s4099_s8 + $0xac] ss:$16 sps:$4 sm:$0xff]  }
 0x322   : > { %1901 = vmatprep.subr.bf16.mxu1 %v3160_v22  ;;  %v3227_v22 = vld [vmem:[%s4099_s8 + $0xa8] ss:$16 sps:$4 sm:$0xff]  }
 0x325   : > { %1902 = vmatpush1.bf16.msra.mxu1 %v3158_v23  ;;  %v3235_v23 = vld [vmem:[%s4099_s8 + $0xcc] ss:$16 sps:$4 sm:$0xff]  }
 0x326   : > { %1903 = vmatprep.subr.bf16.mxu1 %v3163_v24  ;;  %v3233_v24 = vld [vmem:[%s4099_s8 + $0xc8] ss:$16 sps:$4 sm:$0xff]  }
 0x329   : > { %1904 = vmatpush1.bf16.msra.mxu1 %v3161_v25  ;;  %v3238_v25 = vld [vmem:[%s4099_s8 + $0xe4] ss:$16 sps:$4 sm:$0xff]  }
 0x32a   : > { %1905 = vmatprep.subr.bf16.mxu1 %v3166_v26  ;;  %v3241_v26 = vld [vmem:[%s4099_s8 + $0xec] ss:$16 sps:$4 sm:$0xff]  }
 0x32d   : > { %1906 = vmatpush1.bf16.msra.mxu1 %v3164_v27  ;;  %v3236_v27 = vld [vmem:[%s4099_s8 + $0xe0] ss:$16 sps:$4 sm:$0xff]  }
 0x32e   : > { %1907 = vmatprep.subr.bf16.mxu1 %v3169_v29  ;;  %v3239_v29 = vld [vmem:[%s4099_s8 + $0xe8] ss:$16 sps:$4 sm:$0xff]  }
 0x331   : > { %1908 = vmatpush1.bf16.msra.mxu1 %v3167_v30 }
 0x332   : > { %2139 = vmatprep.subr.bf16.mxu1 %v3196_v33 }
 0x334   : > { %1926 = vmatmul.mubr.bf16.vlgmr.msra.gmra.mrb[12].mxu1 %v3783_v15 }
 0x335   : > { %2171 = vmatprep.mubr.bf16.mxu1 %v3314_v28  ;;  %2140 = vmatpush1.bf16.msra.mxu1 %v3194_v31 }
 0x336   : > { %2141 = vmatprep.subr.bf16.mxu1 %v3202_v34 }
 0x339   : > { %2142 = vmatpush1.bf16.msra.mxu1 %v3200_v35 }
 0x33a   : > { %2143 = vmatprep.subr.bf16.mxu1 %v3208_v36  ;;  %v3242_v36 = vld [vmem:[%s4108_s17] sm:$0xff]  }
 0x33d   : > { %2144 = vmatpush1.bf16.msra.mxu1 %v3206_v37  ;;  %v3243_v37 = vld [vmem:[%s4108_s17 + $0x8] sm:$0xff]  }
 0x33e   : > { %2145 = vmatprep.subr.bf16.mxu1 %v3214_v38  ;;  %v3244_v38 = vld [vmem:[%s4108_s17 + $0x10] sm:$0xff]  }
 0x341   : > { %2146 = vmatpush1.bf16.msra.mxu1 %v3212_v42  ;;  %v3245_v42 = vld [vmem:[%s4108_s17 + $0x18] sm:$0xff]  }
 0x342   : > { %2147 = vmatprep.subr.bf16.mxu1 %v3220_v43  ;;  %v3246_v43 = vld [vmem:[%s4108_s17 + $0x20] sm:$0xff]  }
 0x345   : > { %2148 = vmatpush1.bf16.msra.mxu1 %v3218_v9  ;;  %v3247_v9 = vld [vmem:[%s4108_s17 + $0x28] sm:$0xff]  }
 0x346   : > { %2149 = vmatprep.subr.bf16.mxu1 %v3226_v44  ;;  %v3248_v44 = vld [vmem:[%s4108_s17 + $0x30] sm:$0xff]  }
 0x349   : > { %2150 = vmatpush1.bf16.msra.mxu1 %v3224_v45  ;;  %v3249_v45 = vld [vmem:[%s4108_s17 + $0x38] sm:$0xff]  }
 0x34a   : > { %2151 = vmatprep.subr.bf16.mxu1 %v3232_v46  ;;  %v2225_v46 = vld [vmem:[%s4101_s10] sm:$0xf] }
 0x34d   : > { %2152 = vmatpush1.bf16.msra.mxu1 %v3230_v10  ;;  %v2230_v10 = vrot.slane %v2225_v46, %v1402_v41 }
 0x34e   : > { %2153 = vmatprep.subr.bf16.mxu1 %v3238_v25 }
 0x351   : > { %2154 = vmatpush1.bf16.msra.mxu1 %v3236_v27 }
 0x352   : > { %2965 = vmatprep.subr.bf16.mxu1 %v3312_v1 }
 0x3e7   : > { %v1619_v47 = vpop.f32.mrb[8].mxu1 }
 0x3e8   : > { %v2957_v50 = vpop.f32.mrb[9].mxu1 }
 0x3e9   : > { %v1622_v51 = vpop.f32.mrb[10].mxu1 }
 0x3ea   : > { %v1626_v53 = vpack.c.bf16 %v1622_v51, %v1619_v47  ;;  %v2958_v54 = vpop.f32.mrb[11].mxu1 }
 0x3ec   : > { %2960 = vmatpush3.bf16.msra.mxu0 %v1626_v53 }
 0x3ed   : > { %1936 = vmatprep.subr.bf16.mxu0 %v3172_v52 }
 0x3ef   : > { %2962 = vmatmul.mubr.msk.bf16.vlgmr.msra.gmra.mrb[8].mxu0 %vm796_vm1, %v3591_v49  ;;  %v3181_v49 = vld [vmem:[%s4100_s9 + $0x6c] ss:$16 sps:$4 sm:$0xff]  }
 0x3f0   : > { %1937 = vmatpush1.bf16.msra.mxu0 %v3170_v55  ;;  %1968 = vmatprep.mubr.bf16.mxu0 %v3314_v28 }
 0x3f1   : > { %1938 = vmatprep.subr.bf16.mxu0 %v3175_v56 }
 0x3f4   : > { %1939 = vmatpush1.bf16.msra.mxu0 %v3173_v57 }
 0x3f5   : > { %1940 = vmatprep.subr.bf16.mxu0 %v3178_v58 }
 0x3f8   : > { %1941 = vmatpush1.bf16.msra.mxu0 %v3176_v59 }
 0x3f9   : > { %1942 = vmatprep.subr.bf16.mxu0 %v3181_v49  ;;  %v2234_v49 = vrot.slane %v2225_v46, %v1406_v48  ;;  %v2238_v48 = vrot.slane %v2225_v46, %v1410_v5 }
 0x3fc   : > { %1943 = vmatpush1.bf16.msra.mxu0 %v3179_v60 }
 0x3fd   : > { %1944 = vmatprep.subr.bf16.mxu0 %v3184_v61 }
 0x400   : > { %1945 = vmatpush1.bf16.msra.mxu0 %v3182_v62 }
 0x401   : > { %1946 = vmatprep.subr.bf16.mxu0 %v3187_v63 }
 0x404   : > { %1947 = vmatpush1.bf16.msra.mxu0 %v3185_v0 }
 0x405   : > { %1948 = vmatprep.subr.bf16.mxu0 %v3190_v2 }
 0x408   : > { %1949 = vmatpush1.bf16.msra.mxu0 %v3188_v3 }
 0x409   : > { %1950 = vmatprep.subr.bf16.mxu0 %v3193_v6 }
 0x40c   : > { %1951 = vmatpush1.bf16.msra.mxu0 %v3191_v7  ;;  %v2242_v7 = vrot.slane %v2225_v46, %v1414_v4 }
 0x40d   : > { %2182 = vmatprep.subr.bf16.mxu0 %v3199_v8 }
 0x40f   : > { %1969 = vmatmul.mubr.bf16.vlgmr.msra.gmra.mrb[12].mxu0 %v3783_v15  ;;  %v3217_v15 = vld [vmem:[%s4099_s8 + $0x6c] ss:$16 sps:$4 sm:$0xff]  }
 0x410   : > { %2183 = vmatpush1.bf16.msra.mxu0 %v3197_v11  ;;  %2214 = vmatprep.mubr.bf16.mxu0 %v3314_v28  ;;  %v3215_v28 = vld [vmem:[%s4099_s8 + $0x68] ss:$16 sps:$4 sm:$0xff]  }
 0x411   : > { %2184 = vmatprep.subr.bf16.mxu0 %v3205_v14 }
 0x414   : > { %2185 = vmatpush1.bf16.msra.mxu0 %v3203_v16 }
 0x415   : > { %2186 = vmatprep.subr.bf16.mxu0 %v3211_v17 }
 0x418   : > { %2187 = vmatpush1.bf16.msra.mxu0 %v3209_v18 }
 0x419   : > { %2188 = vmatprep.subr.bf16.mxu0 %v3217_v15 }
 0x41c   : > { %2189 = vmatpush1.bf16.msra.mxu0 %v3215_v28 }
 0x41d   : > { %2190 = vmatprep.subr.bf16.mxu0 %v3223_v19 }
 0x420   : > { %2191 = vmatpush1.bf16.msra.mxu0 %v3221_v20 }
 0x421   : > { %2192 = vmatprep.subr.bf16.mxu0 %v3229_v21 }
 0x424   : > { %2193 = vmatpush1.bf16.msra.mxu0 %v3227_v22 }
 0x425   : > { %2194 = vmatprep.subr.bf16.mxu0 %v3235_v23 }
 0x428   : > { %2195 = vmatpush1.bf16.msra.mxu0 %v3233_v24 }
 0x429   : > { %2196 = vmatprep.subr.bf16.mxu0 %v3241_v26 }
 0x42c   : > { %2197 = vmatpush1.bf16.msra.mxu0 %v3239_v29 }
 0x42d   : > { %2985 = vmatprep.subr.bf16.mxu0 %v3312_v1 }
 0x4c2   : > { %v1661_v30 = vpop.f32.mrb[8].mxu0 }
 0x4c3   : > { %v2963_v31 = vpop.f32.mrb[9].mxu0 }
 0x4c4   : > { %v1664_v33 = vpop.f32.mrb[10].mxu0 }
 0x4c5   : > { %v1668_v34 = vpack.c.bf16 %v1664_v33, %v1661_v30  ;;  %v2964_v35 = vpop.f32.mrb[11].mxu0 }
 0x4c7   : > { %2172 = vmatmul.mubr.bf16.vlgmr.msra.gmra.mrb[12].mxu1 %v1668_v34  ;;  %2215 = vmatmul.mubr.bf16.vlgmr.msra.gmra.mrb[12].mxu0 %v1668_v34 }
 0x4c8   : > { %2981 = vmatprep.mubr.msk.bf16.mxu1 %vm3313_vm0, %v3312_v1  ;;  %3001 = vmatprep.mubr.msk.bf16.mxu0 %vm3313_vm0, %v3312_v1 }
 0x4c9   : > { %2966 = vmatpush3.bf16.msra.mxu1 %v3242_v36 }
 0x4ca   : > { %2967 = vmatprep.subr.bf16.mxu1 %v3312_v1 }
 0x4cd   : > { %2968 = vmatpush3.bf16.msra.mxu1 %v3243_v37 }
 0x4ce   : > { %2969 = vmatprep.subr.bf16.mxu1 %v3312_v1 }
 0x4d1   : > { %2970 = vmatpush3.bf16.msra.mxu1 %v3244_v38 }
 0x4d2   : > { %2971 = vmatprep.subr.bf16.mxu1 %v3312_v1 }
 0x4d5   : > { %2972 = vmatpush3.bf16.msra.mxu1 %v3245_v42 }
 0x4d6   : > { %2973 = vmatprep.subr.bf16.mxu1 %v3312_v1 }
 0x4d9   : > { %2974 = vmatpush3.bf16.msra.mxu1 %v3246_v43 }
 0x4da   : > { %2975 = vmatprep.subr.bf16.mxu1 %v3312_v1 }
 0x4dd   : > { %2976 = vmatpush3.bf16.msra.mxu1 %v3247_v9 }
 0x4de   : > { %2977 = vmatprep.subr.bf16.mxu1 %v3312_v1 }
 0x4e1   : > { %2978 = vmatpush3.bf16.msra.mxu1 %v3248_v44 }
 0x4e2   : > { %2979 = vmatprep.subr.bf16.mxu1 %v3312_v1 }
 0x4e5   : > { %2980 = vmatpush3.bf16.msra.mxu1 %v3249_v45 }
 0x59a   : > { %v2173_v47 = vpop.f32.mrb[12].mxu1  ;;  %v2216_v50 = vpop.f32.mrb[12].mxu0 }
 0x59b   : > { %v2247_v51 = vadd.f32 %v2230_v10, %v2173_v47  ;;  %v2175_v52 = vpop.f32.mrb[13].mxu1  ;;  %v2218_v53 = vpop.f32.mrb[13].mxu0  ;;  %v2249_v17 = vadd.f32 %v2238_v48, %v2216_v50 }
 0x59c   : > { %v2177_v54 = vpop.f32.mrb[14].mxu1  ;;  %v2220_v55 = vpop.f32.mrb[14].mxu0  ;;  %v2248_v61 = vadd.f32 %v2234_v49, %v2175_v52  ;;  %v2250_v11 = vadd.f32 %v2242_v7, %v2218_v53 }
 0x59d   : > { %v2842_v56 = vmul.f32 -1.442695, %v2247_v51  ;;  %v2251_v57 = vadd.f32 %v2230_v10, %v2177_v54  ;;  %v2179_v58 = vpop.f32.mrb[15].mxu1  ;;  %v2222_v59 = vpop.f32.mrb[15].mxu0  ;;  %v2253_v21 = vadd.f32 %v2238_v48, %v2220_v55  ;;  %v3251_v48 = vld [vmem:[%s4110_s19 + $0x8] sm:$0xff]  }
 0x59e   : > { %v2252_v62 = vadd.f32 %v2234_v49, %v2179_v58  ;;  %v2844_v41 = vmul.f32 -1.442695, %v2248_v61  ;;  %v2254_v15 = vadd.f32 %v2242_v7, %v2222_v59  ;;  %v2846_v49 = vld [vmem:[%s4104_s13] ss:$0 sm:$0xff] }
 0x59f   : > { %3280 = vpow2.f32 %v2842_v56  ;;  %v2843_v60 = vmul.f32 -1.442695, %v2251_v57  ;;  %v3250_v7 = vld [vmem:[%s4110_s19] sm:$0xff]  }
 0x5a0   : > { %v2845_v0 = vmul.f32 -1.442695, %v2252_v62  ;;  %2986 = vmatpush3.bf16.msra.mxu0 %v3250_v7 }
 0x5a1   : > { %3282 = vpow2.f32 %v2843_v60  ;;  %2987 = vmatprep.subr.bf16.mxu0 %v3312_v1 }
 0x5a2   : > { %3284 = vpow2.f32 %v2844_v41  ;;  %v2847_v41 = vld [vmem:[%s4105_s14] ss:$0 sm:$0xff] }
 0x5a4   : > { %2988 = vmatpush3.bf16.msra.mxu0 %v3251_v48 }
 0x5a5   : > { %2989 = vmatprep.subr.bf16.mxu0 %v3312_v1 }
 0x5a9   : > { %v3281_v63 = vpop.eup %3280 }
 0x5aa   : > { %v2261_v2 = vadd.f32 1.0, %v3281_v63 }
 0x5ab   : > { %v3283_v3 = vpop.eup %3282 }
 0x5ac   : > { %3286 = vrcp.f32 %v2261_v2  ;;  %v2262_v6 = vadd.f32 1.0, %v3283_v3  ;;  %v3285_v8 = vpop.eup %3284 }
 0x5ad   : > { %3288 = vpow2.f32 %v2845_v0  ;;  %v2273_v19 = vadd.f32 1.0, %v3285_v8  ;;  %v3252_v8 = vld [vmem:[%s4110_s19 + $0x10] sm:$0xff]  }
 0x5ae   : > { %3290 = vrcp.f32 %v2262_v6  ;;  %2990 = vmatpush3.bf16.msra.mxu0 %v3252_v8 }
 0x5af   : > { %2991 = vmatprep.subr.bf16.mxu0 %v3312_v1 }
 0x5b6   : > { %v3287_v14 = vpop.eup %3286 }
 0x5b7   : > { %v3289_v16 = vpop.eup %3288  ;;  %v2279_v18 = vmul.f32 %v3287_v14, %v2250_v11  ;;  %v3253_v11 = vld [vmem:[%s4110_s19 + $0x18] sm:$0xff]   ;;  %v3254_v14 = vld [vmem:[%s4110_s19 + $0x20] sm:$0xff]  }
 0x5b8   : > { %v3291_v28 = vpop.eup %3290  ;;  %v2274_v23 = vadd.f32 1.0, %v3289_v16  ;;  %2992 = vmatpush3.bf16.msra.mxu0 %v3253_v11  ;;  %v3255_v16 = vld [vmem:[%s4110_s19 + $0x28] sm:$0xff]  }
 0x5b9   : > { %v2281_v20 = vadd.f32 %v2279_v18, %v2249_v17  ;;  %v2280_v22 = vmul.f32 %v3291_v28, %v2254_v15  ;;  %2993 = vmatprep.subr.bf16.mxu0 %v3312_v1  ;;  %v3256_v17 = vld [vmem:[%s4110_s19 + $0x30] sm:$0xff]   ;;  %v3257_v18 = vld [vmem:[%s4110_s19 + $0x38] sm:$0xff]   ;;  %v2848_v15 = vld [vmem:[%s4109_s18] ss:$0 sm:$0xff] }
 0x5bb   : > { %3292 = vtanh.f32 %v2281_v20  ;;  %v2282_v24 = vadd.f32 %v2280_v22, %v2253_v21 }
 0x5bc   : > { %3294 = vrcp.f32 %v2273_v19  ;;  %2994 = vmatpush3.bf16.msra.mxu0 %v3254_v14 }
 0x5bd   : > { %3296 = vtanh.f32 %v2282_v24  ;;  %2995 = vmatprep.subr.bf16.mxu0 %v3312_v1 }
 0x5be   : > { %3298 = vrcp.f32 %v2274_v23 }
 0x5c0   : > { %2996 = vmatpush3.bf16.msra.mxu0 %v3255_v16 }
 0x5c1   : > { %2997 = vmatprep.subr.bf16.mxu0 %v3312_v1 }
 0x5c4   : > { %2998 = vmatpush3.bf16.msra.mxu0 %v3256_v17 }
 0x5c5   : > { %v3293_v40 = vpop.eup %3292  ;;  %2999 = vmatprep.subr.bf16.mxu0 %v3312_v1 }
 0x5c6   : > { %v3295_v4 = vpop.eup %3294  ;;  %v2285_v5 = vsub.f32 %v3774_v12, %v3293_v40 }
 0x5c7   : > { %v3297_v25 = vpop.eup %3296 }
 0x5c8   : > { %v2287_v26 = vmul.f32 %v3295_v4, %v2285_v5  ;;  %v2286_v27 = vsub.f32 %v3776_v13, %v3297_v25  ;;  %v3299_v29 = vpop.eup %3298  ;;  %3000 = vmatpush3.bf16.msra.mxu0 %v3257_v18 }
 0x5ca   : > { %v2289_v30 = vadd.f32 %v3293_v40, %v2287_v26  ;;  %v2288_v31 = vmul.f32 %v3299_v29, %v2286_v27 }
 0x5cc   : > { %v2293_v33 = vmax.f32 %v2289_v30, 0.0  ;;  %v2290_v34 = vadd.f32 %v3297_v25, %v2288_v31 }
 0x5ce   : > { %v2295_v35 = vmul.f32 %v2293_v33, %v3762_v32  ;;  %v2294_v36 = vmax.f32 %v2290_v34, 0.0 }
 0x5d0   : > { %v2296_v37 = vmul.f32 %v2294_v36, %v3765_v39  ;;  %v2304_v38 = vmul.f32 %v2295_v35, %v2293_v33 }
 0x5d2   : > { %v2297_v42 = vadd.f32 %v2296_v37, %v2295_v35  ;;  %v2305_v43 = vmul.f32 %v2296_v37, %v2294_v36 }
 0x5d4   : > { %v2298_v9 = vrot.slane %v2297_v42, 4  ;;  %v2306_v44 = vadd.f32 %v2305_v43, %v2304_v38 }
 0x5d6   : > { %v2307_v12 = vrot.slane %v2306_v44, 4  ;;  %v2299_v45 = vadd.f32 %v2298_v9, %v2297_v42 }
 0x5d8   : > { %v2308_v46 = vadd.f32 %v2307_v12, %v2306_v44  ;;  %v2300_v10 = vrot.slane %v2299_v45, 2 }
 0x5da   : > { %v2309_v13 = vrot.slane %v2308_v46, 2  ;;  %v2301_v47 = vadd.f32 %v2300_v10, %v2299_v45 }
 0x5dc   : > { %v2310_v50 = vadd.f32 %v2309_v13, %v2308_v46  ;;  %v2302_v51 = vrot.slane %v2301_v47, 1  ;;  %v2857_v46 = vld [vmem:[%s4106_s15] ss:$0 sm:$0xff] }
 0x5de   : > { %v2303_v52 = vadd.f32 %v2302_v51, %v2301_v47  ;;  %v2311_v53 = vrot.slane %v2310_v50, 1 }
 0x5e0   : > { %v2312_v54 = vadd.f32 %v2311_v53, %v2310_v50  ;;  %v2313_v55 = vmul.f32 %v2303_v52, %v2303_v52  ;;  %v2317_v56 = vsub.f32 %v2293_v33, %v2303_v52  ;;  %v2318_v57 = vsub.f32 %v2294_v36, %v2303_v52  ;;  %v2858_v50 = vld [vmem:[%s4107_s16] ss:$0 sm:$0xff] }
 0x5e2   : > { %v2314_v58 = vsub.f32 %v2312_v54, %v2313_v55  ;;  %v2325_v60 = vmul.f32 %v2846_v49, %v2317_v56  ;;  %v2326_v61 = vmul.f32 %v2846_v49, %v2318_v57  ;;  %v2859_v56 = vld [vmem:[%s4111_s20] ss:$0 sm:$0xff] }
 0x5e4   : > { %v2315_v59 = vadd.f32 1e-05, %v2314_v58 }
 0x5e6   : > { %3300 = vrsqrt.f32 %v2315_v59 }
 0x5f0   : > { %v3301_v62 = vpop.eup %3300 }
 0x5f1   : > { %v2327_v63 = vmul.f32 %v3301_v62, %v2325_v60  ;;  %v2328_v0 = vmul.f32 %v3301_v62, %v2326_v61 }
 0x5f3   : > { %v2335_v2 = vadd.f32 %v2847_v41, %v2327_v63  ;;  %v2336_v3 = vadd.f32 %v2847_v41, %v2328_v0 }
 0x5f5   : > { %v2337_v6 = vpack.c.bf16 %v2336_v3, %v2335_v2 }
 0x5f7   : > { %2982 = vmatmul.mubr.bf16.vlgmr.msra.gmra.mrb[16].mxu1 %v2337_v6 }
 0x6ca   : > { %v2443_v28 = vpop.f32.mrb[16].mxu1 }
 0x6cb   : > { %v2444_v19 = vadd.f32 %v2848_v15, %v2443_v28  ;;  %v2983_v20 = vpop.f32.mrb[17].mxu1 }
 0x6cc   : > { %v2446_v21 = vpop.f32.mrb[18].mxu1 }
 0x6cd   : > { %v2452_v22 = vmax.f32 %v2444_v19, 0.0  ;;  %v2447_v23 = vadd.f32 %v2848_v15, %v2446_v21  ;;  %v2984_v24 = vpop.f32.mrb[19].mxu1 }
 0x6cf   : > { %v2454_v40 = vmul.f32 %v2452_v22, %v3762_v32  ;;  %v2453_v4 = vmax.f32 %v2447_v23, 0.0 }
 0x6d1   : > { %v2455_v5 = vmul.f32 %v2453_v4, %v3765_v39  ;;  %v2463_v25 = vmul.f32 %v2454_v40, %v2452_v22 }
 0x6d3   : > { %v2456_v26 = vadd.f32 %v2455_v5, %v2454_v40  ;;  %v2464_v1 = vmul.f32 %v2455_v5, %v2453_v4 }
 0x6d5   : > { %v2457_v27 = vrot.slane %v2456_v26, 4  ;;  %v2465_v29 = vadd.f32 %v2464_v1, %v2463_v25 }
 0x6d7   : > { %v2458_v30 = vadd.f32 %v2457_v27, %v2456_v26  ;;  %v2466_v31 = vrot.slane %v2465_v29, 4 }
 0x6d9   : > { %v2459_v33 = vrot.slane %v2458_v30, 2  ;;  %v2467_v34 = vadd.f32 %v2466_v31, %v2465_v29 }
 0x6db   : > { %v2460_v35 = vadd.f32 %v2459_v33, %v2458_v30  ;;  %v2468_v36 = vrot.slane %v2467_v34, 2 }
 0x6dd   : > { %v2461_v37 = vrot.slane %v2460_v35, 1  ;;  %v2469_v38 = vadd.f32 %v2468_v36, %v2467_v34 }
 0x6df   : > { %v2462_v42 = vadd.f32 %v2461_v37, %v2460_v35  ;;  %v2470_v43 = vrot.slane %v2469_v38, 1 }
 0x6e1   : > { %v2471_v9 = vadd.f32 %v2470_v43, %v2469_v38  ;;  %v2472_v32 = vmul.f32 %v2462_v42, %v2462_v42  ;;  %v2476_v44 = vsub.f32 %v2452_v22, %v2462_v42  ;;  %v2477_v12 = vsub.f32 %v2453_v4, %v2462_v42 }
 0x6e3   : > { %v2473_v39 = vsub.f32 %v2471_v9, %v2472_v32  ;;  %v2484_v10 = vmul.f32 %v2857_v46, %v2476_v44  ;;  %v2485_v13 = vmul.f32 %v2857_v46, %v2477_v12 }
 0x6e5   : > { %v2474_v45 = vadd.f32 1e-05, %v2473_v39 }
 0x6e7   : > { %3302 = vrsqrt.f32 %v2474_v45 }
 0x6f1   : > { %v3303_v47 = vpop.eup %3302 }
 0x6f2   : > { %v2487_v51 = vmul.f32 %v3303_v47, %v2485_v13  ;;  %v2486_v52 = vmul.f32 %v3303_v47, %v2484_v10 }
 0x6f4   : > { %v2494_v53 = vadd.f32 %v2858_v50, %v2486_v52  ;;  %v2495_v54 = vadd.f32 %v2858_v50, %v2487_v51 }
 0x6f6   : > { %v2496_v55 = vpack.c.bf16 %v2495_v54, %v2494_v53 }
 0x6f8   : > { %3002 = vmatmul.mubr.bf16.vlgmr.msra.gmra.mrb[16].mxu0 %v2496_v55 }
 0x7cb   : > { %v2602_v57 = vpop.f32.mrb[16].mxu0 }
 0x7cc   : > { %v2603_v58 = vadd.f32 %v2859_v56, %v2602_v57  ;;  %v3003_v59 = vpop.f32.mrb[17].mxu0 }
 0x7cd   : > { %v2605_v49 = vpop.f32.mrb[18].mxu0 }
 0x7ce   : > { %2609 = vst [vmem:[%s676_s3] sm:$0xff] %v2603_v58  ;;  %v2606_v60 = vadd.f32 %v2859_v56, %v2605_v49  ;;  %v3004_v61 = vpop.f32.mrb[19].mxu0 }
 0x7d0   : > { %2610 = vst [vmem:[%s676_s3 + $0x8] sm:$0xff] %v2606_v60 }
 0x7d1 PF: > { %s4134_s5 = sld [smem:[#allocation2_spill]] }
 0x7d7   : > { %s31_s2 = sadd.s32 1, %s4134_s5  }
 0x7d8   : > { %p28_p4 = scmp.ge.s32.totalorder %s31_s2, 6  }
 0x7da   :  { %30 = sbr.rel (!%p28_p4) target bundleno = 7 (0x7), region = 137 }

</bundles_post_ra>
